<compile_context>
chip_gen: v7x
topology: tpu7x:2x2x1
jax: 0.10.0
libtpu: 0.0.40
codegen_flags: <defaults>
</compile_context>

<pallas_src>
import functools

import jax
import jax.numpy as jnp
from jax.experimental import pallas as pl
from jax.experimental.pallas import tpu as pltpu

EPS = 1e-5  # nn.InstanceNorm2d default


# ----------------------------------------------------------------------------
# In-kernel helper: per-channel totals when channels are interleaved on lanes
# with period C (layout (.., W*C)).  Circular lane rolls -> exact class sums.
# ----------------------------------------------------------------------------
def _tiled_channel_sum(row, C, W):
    """row: (1, W*C).  Returns (1, W*C): every lane j*C+c holds sum_j' row[j'*C+c]."""
    if W & (W - 1) == 0:                       # power of two: log2(W) roll+adds
        total, span = row, 1
        while span < W:
            total = total + pltpu.roll(total, shift=span * C, axis=1)
            span *= 2
        return total
    total = row                                # general fallback: W-1 rolls
    for t in range(1, W):
        total = total + pltpu.roll(row, shift=t * C, axis=1)
    return total


# ----------------------------------------------------------------------------
# Fused kernel: [InstanceNorm -> PReLU -> Conv2d(KxK, SAME) + bias] x 2
# for ONE batch sample (grid iterates over the batch).
# Layout inside kernel: (H, W*C), channels fastest along the lane axis.
# ----------------------------------------------------------------------------
def _unet_up_kernel(x_ref, wt1_ref, b1_ref, a1_ref, wt2_ref, b2_ref, a2_ref,
                    o_ref, pad_ref, *, H, W, Ccat, Cout, K):
    P = K // 2
    Hp, Wp = H + 2 * P, W + 2 * P
    inv_hw = 1.0 / float(H * W)

    # Zero only the halo border of the padded-activation scratch; the interior
    # is fully overwritten by each conv block below.
    pad_ref[0:P, :] = jnp.zeros((P, Wp * Ccat), jnp.float32)
    pad_ref[P + H:Hp, :] = jnp.zeros((P, Wp * Ccat), jnp.float32)
    pad_ref[P:P + H, 0:P * Ccat] = jnp.zeros((H, P * Ccat), jnp.float32)
    pad_ref[P:P + H, (P + W) * Ccat:Wp * Ccat] = jnp.zeros((H, P * Ccat), jnp.float32)

    def norm_prelu(x, alpha_tiled):
        # InstanceNorm2d (biased variance, eps inside rsqrt) + per-channel PReLU,
        # with channels interleaved along lanes (period Ccat).
        mean = _tiled_channel_sum(jnp.sum(x, axis=0, keepdims=True), Ccat, W) * inv_hw
        xc = x - mean
        var = _tiled_channel_sum(jnp.sum(xc * xc, axis=0, keepdims=True), Ccat, W) * inv_hw
        xn = xc * jax.lax.rsqrt(var + EPS)
        return jnp.where(xn >= 0, xn, alpha_tiled * xn)

    def conv(xg, wt_ref, bias_tiled, Co):
        # SAME KxK conv == K row-band matmuls vs. block-Toeplitz weights (bf16).
        pad_ref[P:P + H, P * Ccat:(P + W) * Ccat] = xg
        acc = jnp.zeros((H, W * Co), jnp.float32)
        for kh in range(K):                    # unrolled: K dots, depth Wp*Ccat
            rows = pad_ref[kh:kh + H, :].astype(jnp.bfloat16)
            acc = acc + jnp.dot(rows, wt_ref[kh],
                                preferred_element_type=jnp.float32)
        return acc + bias_tiled

    # Dropout: identity (eval mode).
    x0 = x_ref[0].astype(jnp.float32)                      # (H, W*Ccat)
    h1 = conv(norm_prelu(x0, a1_ref[...]), wt1_ref, b1_ref[...], Ccat)
    h2 = conv(norm_prelu(h1, a2_ref[...]), wt2_ref, b2_ref[...], Cout)
    o_ref[0] = h2.astype(o_ref.dtype)                      # lane-dense (H, W*Cout)


def _fused_forward(x2d, wt1, b1t, a1t, wt2, b2t, a2t, *, H, W, Ccat, Cout, K):
    N = x2d.shape[0]
    P = K // 2
    Hp, Wp = H + 2 * P, W + 2 * P
    kernel = functools.partial(_unet_up_kernel,
                               H=H, W=W, Ccat=Ccat, Cout=Cout, K=K)
    return pl.pallas_call(
        kernel,
        out_shape=jax.ShapeDtypeStruct((N, H, W * Cout), jnp.float32),
        grid_spec=pltpu.PrefetchScalarGridSpec(
            num_scalar_prefetch=0,
            grid=(N,),
            in_specs=[
                pl.BlockSpec((1, H, W * Ccat), lambda n: (n, 0, 0)),
                pl.BlockSpec((K, Wp * Ccat, W * Ccat), lambda n: (0, 0, 0)),
                pl.BlockSpec((1, W * Ccat), lambda n: (0, 0)),
                pl.BlockSpec((1, W * Ccat), lambda n: (0, 0)),
                pl.BlockSpec((K, Wp * Ccat, W * Cout), lambda n: (0, 0, 0)),
                pl.BlockSpec((1, W * Cout), lambda n: (0, 0)),
                pl.BlockSpec((1, W * Ccat), lambda n: (0, 0)),
            ],
            out_specs=pl.BlockSpec((1, H, W * Cout), lambda n: (n, 0, 0)),
            scratch_shapes=[pltpu.VMEM((Hp, Wp * Ccat), jnp.float32)],
        ),
        compiler_params=pltpu.CompilerParams(
            dimension_semantics=("parallel",)),
    )(x2d, wt1, b1t, a1t, wt2, b2t, a2t)


# ----------------------------------------------------------------------------
# One-time parameter preprocessing (outside the hot path)
# ----------------------------------------------------------------------------
def _toeplitz_weights(w, W):
    """HWIO conv weights -> block-Toeplitz (K, Wp*Cin, W*Cout) in bf16.

    WT[kh, jw*Cin+ci, j*Cout+co] = w[kh, jw-j, ci, co] if 0 <= jw-j < K else 0,
    so  sum_kh  padded_row_band[kh] @ WT[kh]  equals a SAME KxK convolution.
    """
    K, K2, Cin, Cout = w.shape
    assert K == K2 and K % 2 == 1, "odd square kernels only"
    P = K // 2
    Wp = W + 2 * P
    sel = (jnp.arange(Wp)[None, :, None]
           == jnp.arange(W)[None, None, :] + jnp.arange(K)[:, None, None])
    wt = jnp.einsum("kwj,hkio->hwijo", sel.astype(w.dtype), w)
    return wt.reshape(K, Wp * Cin, W * Cout).astype(jnp.bfloat16)


def prepare_unet_up_params(w1, b1, a1, w2, b2, a2, *, W):
    def tile(v):
        return jnp.tile(jnp.asarray(v, jnp.float32).reshape(-1), W)[None, :]
    return dict(wt1=_toeplitz_weights(w1, W), b1=tile(b1), a1=tile(a1),
                wt2=_toeplitz_weights(w2, W), b2=tile(b2), a2=tile(a2))


# ----------------------------------------------------------------------------
# Public forward (PyTorch-style NCHW at the boundary)
# ----------------------------------------------------------------------------
@functools.partial(jax.jit, static_argnames=("K",))
def unet_up_block(bot_nchw, hor_nchw, params, *, K=5):
    N, Cb, Hb, Wb = bot_nchw.shape
    Ch = hor_nchw.shape[1]
    Ccat = Cb + Ch
    H, W = 2 * Hb, 2 * Wb
    Cout = params["b2"].shape[1] // W

    bot = jnp.transpose(bot_nchw, (0, 2, 3, 1))                  # NCHW -> NHWC
    hor = jnp.transpose(hor_nchw, (0, 2, 3, 1))
    bot_big = jnp.repeat(jnp.repeat(bot, 2, axis=1), 2, axis=2)  # TrivialUpsample 2x
    dh, dw = hor.shape[1] - H, hor.shape[2] - W                  # cut_to_match
    hor_c = hor[:, dh // 2:dh // 2 + H, dw // 2:dw // 2 + W, :]
    x = jnp.concatenate([bot_big, hor_c], axis=-1)               # (N, H, W, Ccat)
    x2d = x.reshape(N, H, W * Ccat)                              # lane-dense slab

    out2d = _fused_forward(x2d, params["wt1"], params["b1"], params["a1"],
                           params["wt2"], params["b2"], params["a2"],
                           H=H, W=W, Ccat=Ccat, Cout=Cout, K=K)
    return jnp.transpose(out2d.reshape(N, H, W, Cout), (0, 3, 1, 2))


# ----------------------------------------------------------------------------
# Pure-JAX reference (for correctness checks)
# ----------------------------------------------------------------------------
def _conv_block_ref(x, w, b, alpha, *, bf16):
    mean = jnp.mean(x, axis=(1, 2), keepdims=True)
    var = jnp.mean((x - mean) ** 2, axis=(1, 2), keepdims=True)
    xn = (x - mean) * jax.lax.rsqrt(var + EPS)
    xg = jnp.where(xn >= 0, xn, alpha.reshape(1, 1, 1, -1) * xn)
    lhs = xg.astype(jnp.bfloat16) if bf16 else xg
    rhs = w.astype(jnp.bfloat16) if bf16 else w
    y = jax.lax.conv_general_dilated(
        lhs, rhs, window_strides=(1, 1), padding="SAME",
        dimension_numbers=("NHWC", "HWIO", "NHWC"),
        preferred_element_type=jnp.float32)
    return y + b.reshape(1, 1, 1, -1)


def unet_up_block_ref(bot_nchw, hor_nchw, w1, b1, a1, w2, b2, a2, *, bf16=False):
    bot = jnp.transpose(bot_nchw, (0, 2, 3, 1))
    hor = jnp.transpose(hor_nchw, (0, 2, 3, 1))
    bot_big = jnp.repeat(jnp.repeat(bot, 2, axis=1), 2, axis=2)
    H, W = bot_big.shape[1], bot_big.shape[2]
    dh, dw = hor.shape[1] - H, hor.shape[2] - W
    hor_c = hor[:, dh // 2:dh // 2 + H, dw // 2:dw // 2 + W, :]
    x = jnp.concatenate([bot_big, hor_c], axis=-1)
    x = _conv_block_ref(x, w1, b1, a1, bf16=bf16)
    x = _conv_block_ref(x, w2, b2, a2, bf16=bf16)
    return jnp.transpose(x, (0, 3, 1, 2))


# ----------------------------------------------------------------------------
if __name__ == "__main__":
    N = 2
    BOT_C, HOR_C, OUT_C = 8, 8, 8
    CAT_C = BOT_C + HOR_C
    K = 5
    Hb, Wb = 8, 8        # bottom feature map -> upsampled to 16x16
    Hh, Wh = 18, 18      # horizontal skip   -> center-cropped to 16x16

    key = jax.random.PRNGKey(0)
    k_bot, k_hor, k_w1, k_b1, k_w2, k_b2 = jax.random.split(key, 6)

    bot = jax.random.normal(k_bot, (N, BOT_C, Hb, Wb), jnp.float32)
    hor = jax.random.normal(k_hor, (N, HOR_C, Hh, Wh), jnp.float32)

    def init_conv(kw, kb, cin, cout):
        bound = 1.0 / (cin * K * K) ** 0.5     # PyTorch-style uniform init
        w = jax.random.uniform(kw, (K, K, cin, cout), jnp.float32, -bound, bound)
        b = jax.random.uniform(kb, (cout,), jnp.float32, -bound, bound)
        return w, b

    w1, b1 = init_conv(k_w1, k_b1, CAT_C, CAT_C)
    w2, b2 = init_conv(k_w2, k_b2, CAT_C, OUT_C)
    a1 = jnp.full((CAT_C,), 0.25, jnp.float32)   # PReLU default init
    a2 = jnp.full((CAT_C,), 0.25, jnp.float32)

    params = prepare_unet_up_params(w1, b1, a1, w2, b2, a2, W=2 * Wb)

    out = unet_up_block(bot, hor, params, K=K)
    out = jax.block_until_ready(out)
    assert out.shape == (N, OUT_C, 2 * Hb, 2 * Wb), out.shape

    # Tight check vs. a reference using the same numerics policy
    # (bf16 MXU operands, f32 accumulation).
    ref_bf16 = unet_up_block_ref(bot, hor, w1, b1, a1, w2, b2, a2, bf16=True)
    err_b = float(jnp.max(jnp.abs(out - ref_bf16)))
    assert jnp.allclose(out, ref_bf16, atol=1e-2, rtol=1e-2), err_b

    # Loose sanity check vs. the full-f32 reference (bounds the bf16-MXU error).
    ref_f32 = unet_up_block_ref(bot, hor, w1, b1, a1, w2, b2, a2, bf16=False)
    err_f = float(jnp.max(jnp.abs(out - ref_f32)))
    assert jnp.allclose(out, ref_f32, atol=5e-2, rtol=5e-2), err_f

    print("KERNEL_OK")
</pallas_src>

<mosaic_0001>
module attributes {stable_mosaic.version = 11 : i64} {
  func.func @_unet_up_kernel(%arg0: i32, %arg1: memref<1x16x256xf32, #tpu.memory_space<vmem>>, %arg2: memref<5x320x256xbf16, #tpu.memory_space<vmem>>, %arg3: memref<1x256xf32, #tpu.memory_space<vmem>>, %arg4: memref<1x256xf32, #tpu.memory_space<vmem>>, %arg5: memref<5x320x128xbf16, #tpu.memory_space<vmem>>, %arg6: memref<1x128xf32, #tpu.memory_space<vmem>>, %arg7: memref<1x256xf32, #tpu.memory_space<vmem>>, %arg8: memref<1x16x128xf32, #tpu.memory_space<vmem>>, %arg9: memref<20x320xf32, #tpu.memory_space<vmem>>) attributes {dimension_semantics = [#tpu.dimension_semantics<parallel>], iteration_bounds = array<i64: 2>, scalar_prefetch = 0 : i64, scratch_operands = 1 : i64, tpu.core_type = #tpu.core_type<tc>, window_params = [{transform_indices = @transform_0, window_bounds = array<i64: 1, 16, 256>}, {pipeline_mode = #tpu.pipeline_mode<synchronous>, transform_indices = @transform_1, window_bounds = array<i64: 5, 320, 256>}, {pipeline_mode = #tpu.pipeline_mode<synchronous>, transform_indices = @transform_2, window_bounds = array<i64: 1, 256>}, {pipeline_mode = #tpu.pipeline_mode<synchronous>, transform_indices = @transform_3, window_bounds = array<i64: 1, 256>}, {pipeline_mode = #tpu.pipeline_mode<synchronous>, transform_indices = @transform_4, window_bounds = array<i64: 5, 320, 128>}, {pipeline_mode = #tpu.pipeline_mode<synchronous>, transform_indices = @transform_5, window_bounds = array<i64: 1, 128>}, {pipeline_mode = #tpu.pipeline_mode<synchronous>, transform_indices = @transform_6, window_bounds = array<i64: 1, 256>}, {transform_indices = @transform_7, window_bounds = array<i64: 1, 16, 128>}]} {
    %cst = arith.constant 0.000000e+00 : f32
    %0 = vector.broadcast %cst : f32 to vector<2x320xf32>
    %c0 = arith.constant 0 : index
    %c0_0 = arith.constant 0 : index
    %1 = vector.load %arg9[%c0, %c0_0] : memref<20x320xf32, #tpu.memory_space<vmem>>, vector<2x320xf32>
    tpu.vector_store %arg9[%c0, %c0_0], %0 {strides = array<i32>} : memref<20x320xf32, #tpu.memory_space<vmem>>, vector<2x320xf32>,
    %cst_1 = arith.constant 0.000000e+00 : f32
    %2 = vector.broadcast %cst_1 : f32 to vector<2x320xf32>
    %c18 = arith.constant 18 : index
    %c0_2 = arith.constant 0 : index
    %3 = vector.load %arg9[%c18, %c0_2] : memref<20x320xf32, #tpu.memory_space<vmem>>, vector<2x320xf32>
    tpu.vector_store %arg9[%c18, %c0_2], %2 {strides = array<i32>} : memref<20x320xf32, #tpu.memory_space<vmem>>, vector<2x320xf32>,
    %cst_3 = arith.constant 0.000000e+00 : f32
    %4 = vector.broadcast %cst_3 : f32 to vector<16x32xf32>
    %c2 = arith.constant 2 : index
    %c0_4 = arith.constant 0 : index
    %5 = vector.load %arg9[%c2, %c0_4] : memref<20x320xf32, #tpu.memory_space<vmem>>, vector<16x32xf32>
    tpu.vector_store %arg9[%c2, %c0_4], %4 {strides = array<i32>} : memref<20x320xf32, #tpu.memory_space<vmem>>, vector<16x32xf32>,
    %cst_5 = arith.constant 0.000000e+00 : f32
    %6 = vector.broadcast %cst_5 : f32 to vector<16x32xf32>
    %c2_6 = arith.constant 2 : index
    %c288 = arith.constant 288 : index
    %7 = vector.load %arg9[%c2_6, %c288] : memref<20x320xf32, #tpu.memory_space<vmem>>, vector<16x32xf32>
    tpu.vector_store %arg9[%c2_6, %c288], %6 {strides = array<i32>} : memref<20x320xf32, #tpu.memory_space<vmem>>, vector<16x32xf32>,
    %c0_7 = arith.constant 0 : index
    %c0_8 = arith.constant 0 : index
    %c0_9 = arith.constant 0 : index
    %8 = vector.load %arg1[%c0_7, %c0_8, %c0_9] : memref<1x16x256xf32, #tpu.memory_space<vmem>>, vector<1x16x256xf32>
    %9 = vector.shape_cast %8 : vector<1x16x256xf32> to vector<16x256xf32>
    %c0_10 = arith.constant 0 : index
    %c0_11 = arith.constant 0 : index
    %10 = vector.load %arg4[%c0_10, %c0_11] : memref<1x256xf32, #tpu.memory_space<vmem>>, vector<1x256xf32>
    %cst_12 = arith.constant dense<0.000000e+00> : vector<256xf32>
    %11 = vector.multi_reduction <add>, %9, %cst_12 [0] : vector<16x256xf32> to vector<256xf32>
    %12 = vector.shape_cast %11 : vector<256xf32> to vector<1x256xf32>
    %c16_i32 = arith.constant 16 : i32
    %13 = tpu.dynamic_rotate %12 by %c16_i32 dim 1 : vector<1x256xf32>, i32 -> vector<1x256xf32>
    %14 = arith.addf %12, %13 : vector<1x256xf32>
    %c32_i32 = arith.constant 32 : i32
    %15 = tpu.dynamic_rotate %14 by %c32_i32 dim 1 : vector<1x256xf32>, i32 -> vector<1x256xf32>
    %16 = arith.addf %14, %15 : vector<1x256xf32>
    %c64_i32 = arith.constant 64 : i32
    %17 = tpu.dynamic_rotate %16 by %c64_i32 dim 1 : vector<1x256xf32>, i32 -> vector<1x256xf32>
    %18 = arith.addf %16, %17 : vector<1x256xf32>
    %c128_i32 = arith.constant 128 : i32
    %19 = tpu.dynamic_rotate %18 by %c128_i32 dim 1 : vector<1x256xf32>, i32 -> vector<1x256xf32>
    %20 = arith.addf %18, %19 : vector<1x256xf32>
    %cst_13 = arith.constant 3.906250e-03 : f32
    %21 = vector.broadcast %cst_13 : f32 to vector<1x256xf32>
    %22 = arith.mulf %20, %21 : vector<1x256xf32>
    %23 = vector.broadcast %22 : vector<1x256xf32> to vector<16x256xf32>
    %24 = arith.subf %9, %23 : vector<16x256xf32>
    %25 = arith.mulf %24, %24 : vector<16x256xf32>
    %cst_14 = arith.constant dense<0.000000e+00> : vector<256xf32>
    %26 = vector.multi_reduction <add>, %25, %cst_14 [0] : vector<16x256xf32> to vector<256xf32>
    %27 = vector.shape_cast %26 : vector<256xf32> to vector<1x256xf32>
    %c16_i32_15 = arith.constant 16 : i32
    %28 = tpu.dynamic_rotate %27 by %c16_i32_15 dim 1 : vector<1x256xf32>, i32 -> vector<1x256xf32>
    %29 = arith.addf %27, %28 : vector<1x256xf32>
    %c32_i32_16 = arith.constant 32 : i32
    %30 = tpu.dynamic_rotate %29 by %c32_i32_16 dim 1 : vector<1x256xf32>, i32 -> vector<1x256xf32>
    %31 = arith.addf %29, %30 : vector<1x256xf32>
    %c64_i32_17 = arith.constant 64 : i32
    %32 = tpu.dynamic_rotate %31 by %c64_i32_17 dim 1 : vector<1x256xf32>, i32 -> vector<1x256xf32>
    %33 = arith.addf %31, %32 : vector<1x256xf32>
    %c128_i32_18 = arith.constant 128 : i32
    %34 = tpu.dynamic_rotate %33 by %c128_i32_18 dim 1 : vector<1x256xf32>, i32 -> vector<1x256xf32>
    %35 = arith.addf %33, %34 : vector<1x256xf32>
    %cst_19 = arith.constant 3.906250e-03 : f32
    %36 = vector.broadcast %cst_19 : f32 to vector<1x256xf32>
    %37 = arith.mulf %35, %36 : vector<1x256xf32>
    %cst_20 = arith.constant 9.99999974E-6 : f32
    %38 = vector.broadcast %cst_20 : f32 to vector<1x256xf32>
    %39 = arith.addf %37, %38 : vector<1x256xf32>
    %40 = math.rsqrt %39 : vector<1x256xf32>
    %41 = vector.broadcast %40 : vector<1x256xf32> to vector<16x256xf32>
    %42 = arith.mulf %24, %41 : vector<16x256xf32>
    %cst_21 = arith.constant 0.000000e+00 : f32
    %43 = vector.broadcast %cst_21 : f32 to vector<16x256xf32>
    %44 = arith.cmpf oge, %42, %43 : vector<16x256xf32>
    %45 = vector.broadcast %10 : vector<1x256xf32> to vector<16x256xf32>
    %46 = arith.mulf %45, %42 : vector<16x256xf32>
    %47 = arith.select %44, %42, %46 : vector<16x256xi1>, vector<16x256xf32>
    %c0_22 = arith.constant 0 : index
    %c0_23 = arith.constant 0 : index
    %48 = vector.load %arg3[%c0_22, %c0_23] : memref<1x256xf32, #tpu.memory_space<vmem>>, vector<1x256xf32>
    %c2_24 = arith.constant 2 : index
    %c32 = arith.constant 32 : index
    %49 = vector.load %arg9[%c2_24, %c32] : memref<20x320xf32, #tpu.memory_space<vmem>>, vector<16x256xf32>
    tpu.vector_store %arg9[%c2_24, %c32], %47 {strides = array<i32>} : memref<20x320xf32, #tpu.memory_space<vmem>>, vector<16x256xf32>,
    %cst_25 = arith.constant 0.000000e+00 : f32
    %50 = vector.broadcast %cst_25 : f32 to vector<16x256xf32>
    %c0_26 = arith.constant 0 : index
    %c0_27 = arith.constant 0 : index
    %51 = vector.load %arg9[%c0_26, %c0_27] : memref<20x320xf32, #tpu.memory_space<vmem>>, vector<16x320xf32>
    %52 = arith.truncf %51 : vector<16x320xf32> to vector<16x320xbf16>
    %c0_28 = arith.constant 0 : index
    %c0_29 = arith.constant 0 : index
    %c0_30 = arith.constant 0 : index
    %53 = vector.load %arg2[%c0_28, %c0_29, %c0_30] : memref<5x320x256xbf16, #tpu.memory_space<vmem>>, vector<1x320x256xbf16>
    %54 = vector.shape_cast %53 : vector<1x320x256xbf16> to vector<320x256xbf16>
    %cst_31 = arith.constant dense<0.000000e+00> : vector<16x256xf32>
    %55 = tpu.matmul %52, %54, %cst_31 {dimension_numbers = #tpu.dot_dimension_numbers<[1], [0], [0], [1], [0, 0, 1, 1], [], []>} : vector<16x320xbf16>, vector<320x256xbf16>, vector<16x256xf32> -> vector<16x256xf32>
    %56 = arith.addf %50, %55 : vector<16x256xf32>
    %c1 = arith.constant 1 : index
    %c0_32 = arith.constant 0 : index
    %57 = vector.load %arg9[%c1, %c0_32] : memref<20x320xf32, #tpu.memory_space<vmem>>, vector<16x320xf32>
    %58 = arith.truncf %57 : vector<16x320xf32> to vector<16x320xbf16>
    %c1_33 = arith.constant 1 : index
    %c0_34 = arith.constant 0 : index
    %c0_35 = arith.constant 0 : index
    %59 = vector.load %arg2[%c1_33, %c0_34, %c0_35] : memref<5x320x256xbf16, #tpu.memory_space<vmem>>, vector<1x320x256xbf16>
    %60 = vector.shape_cast %59 : vector<1x320x256xbf16> to vector<320x256xbf16>
    %cst_36 = arith.constant dense<0.000000e+00> : vector<16x256xf32>
    %61 = tpu.matmul %58, %60, %cst_36 {dimension_numbers = #tpu.dot_dimension_numbers<[1], [0], [0], [1], [0, 0, 1, 1], [], []>} : vector<16x320xbf16>, vector<320x256xbf16>, vector<16x256xf32> -> vector<16x256xf32>
    %62 = arith.addf %56, %61 : vector<16x256xf32>
    %c2_37 = arith.constant 2 : index
    %c0_38 = arith.constant 0 : index
    %63 = vector.load %arg9[%c2_37, %c0_38] : memref<20x320xf32, #tpu.memory_space<vmem>>, vector<16x320xf32>
    %64 = arith.truncf %63 : vector<16x320xf32> to vector<16x320xbf16>
    %c2_39 = arith.constant 2 : index
    %c0_40 = arith.constant 0 : index
    %c0_41 = arith.constant 0 : index
    %65 = vector.load %arg2[%c2_39, %c0_40, %c0_41] : memref<5x320x256xbf16, #tpu.memory_space<vmem>>, vector<1x320x256xbf16>
    %66 = vector.shape_cast %65 : vector<1x320x256xbf16> to vector<320x256xbf16>
    %cst_42 = arith.constant dense<0.000000e+00> : vector<16x256xf32>
    %67 = tpu.matmul %64, %66, %cst_42 {dimension_numbers = #tpu.dot_dimension_numbers<[1], [0], [0], [1], [0, 0, 1, 1], [], []>} : vector<16x320xbf16>, vector<320x256xbf16>, vector<16x256xf32> -> vector<16x256xf32>
    %68 = arith.addf %62, %67 : vector<16x256xf32>
    %c3 = arith.constant 3 : index
    %c0_43 = arith.constant 0 : index
    %69 = vector.load %arg9[%c3, %c0_43] : memref<20x320xf32, #tpu.memory_space<vmem>>, vector<16x320xf32>
    %70 = arith.truncf %69 : vector<16x320xf32> to vector<16x320xbf16>
    %c3_44 = arith.constant 3 : index
    %c0_45 = arith.constant 0 : index
    %c0_46 = arith.constant 0 : index
    %71 = vector.load %arg2[%c3_44, %c0_45, %c0_46] : memref<5x320x256xbf16, #tpu.memory_space<vmem>>, vector<1x320x256xbf16>
    %72 = vector.shape_cast %71 : vector<1x320x256xbf16> to vector<320x256xbf16>
    %cst_47 = arith.constant dense<0.000000e+00> : vector<16x256xf32>
    %73 = tpu.matmul %70, %72, %cst_47 {dimension_numbers = #tpu.dot_dimension_numbers<[1], [0], [0], [1], [0, 0, 1, 1], [], []>} : vector<16x320xbf16>, vector<320x256xbf16>, vector<16x256xf32> -> vector<16x256xf32>
    %74 = arith.addf %68, %73 : vector<16x256xf32>
    %c4 = arith.constant 4 : index
    %c0_48 = arith.constant 0 : index
    %75 = vector.load %arg9[%c4, %c0_48] : memref<20x320xf32, #tpu.memory_space<vmem>>, vector<16x320xf32>
    %76 = arith.truncf %75 : vector<16x320xf32> to vector<16x320xbf16>
    %c4_49 = arith.constant 4 : index
    %c0_50 = arith.constant 0 : index
    %c0_51 = arith.constant 0 : index
    %77 = vector.load %arg2[%c4_49, %c0_50, %c0_51] : memref<5x320x256xbf16, #tpu.memory_space<vmem>>, vector<1x320x256xbf16>
    %78 = vector.shape_cast %77 : vector<1x320x256xbf16> to vector<320x256xbf16>
    %cst_52 = arith.constant dense<0.000000e+00> : vector<16x256xf32>
    %79 = tpu.matmul %76, %78, %cst_52 {dimension_numbers = #tpu.dot_dimension_numbers<[1], [0], [0], [1], [0, 0, 1, 1], [], []>} : vector<16x320xbf16>, vector<320x256xbf16>, vector<16x256xf32> -> vector<16x256xf32>
    %80 = arith.addf %74, %79 : vector<16x256xf32>
    %81 = vector.broadcast %48 : vector<1x256xf32> to vector<16x256xf32>
    %82 = arith.addf %80, %81 : vector<16x256xf32>
    %c0_53 = arith.constant 0 : index
    %c0_54 = arith.constant 0 : index
    %83 = vector.load %arg7[%c0_53, %c0_54] : memref<1x256xf32, #tpu.memory_space<vmem>>, vector<1x256xf32>
    %cst_55 = arith.constant dense<0.000000e+00> : vector<256xf32>
    %84 = vector.multi_reduction <add>, %82, %cst_55 [0] : vector<16x256xf32> to vector<256xf32>
    %85 = vector.shape_cast %84 : vector<256xf32> to vector<1x256xf32>
    %c16_i32_56 = arith.constant 16 : i32
    %86 = tpu.dynamic_rotate %85 by %c16_i32_56 dim 1 : vector<1x256xf32>, i32 -> vector<1x256xf32>
    %87 = arith.addf %85, %86 : vector<1x256xf32>
    %c32_i32_57 = arith.constant 32 : i32
    %88 = tpu.dynamic_rotate %87 by %c32_i32_57 dim 1 : vector<1x256xf32>, i32 -> vector<1x256xf32>
    %89 = arith.addf %87, %88 : vector<1x256xf32>
    %c64_i32_58 = arith.constant 64 : i32
    %90 = tpu.dynamic_rotate %89 by %c64_i32_58 dim 1 : vector<1x256xf32>, i32 -> vector<1x256xf32>
    %91 = arith.addf %89, %90 : vector<1x256xf32>
    %c128_i32_59 = arith.constant 128 : i32
    %92 = tpu.dynamic_rotate %91 by %c128_i32_59 dim 1 : vector<1x256xf32>, i32 -> vector<1x256xf32>
    %93 = arith.addf %91, %92 : vector<1x256xf32>
    %cst_60 = arith.constant 3.906250e-03 : f32
    %94 = vector.broadcast %cst_60 : f32 to vector<1x256xf32>
    %95 = arith.mulf %93, %94 : vector<1x256xf32>
    %96 = vector.broadcast %95 : vector<1x256xf32> to vector<16x256xf32>
    %97 = arith.subf %82, %96 : vector<16x256xf32>
    %98 = arith.mulf %97, %97 : vector<16x256xf32>
    %cst_61 = arith.constant dense<0.000000e+00> : vector<256xf32>
    %99 = vector.multi_reduction <add>, %98, %cst_61 [0] : vector<16x256xf32> to vector<256xf32>
    %100 = vector.shape_cast %99 : vector<256xf32> to vector<1x256xf32>
    %c16_i32_62 = arith.constant 16 : i32
    %101 = tpu.dynamic_rotate %100 by %c16_i32_62 dim 1 : vector<1x256xf32>, i32 -> vector<1x256xf32>
    %102 = arith.addf %100, %101 : vector<1x256xf32>
    %c32_i32_63 = arith.constant 32 : i32
    %103 = tpu.dynamic_rotate %102 by %c32_i32_63 dim 1 : vector<1x256xf32>, i32 -> vector<1x256xf32>
    %104 = arith.addf %102, %103 : vector<1x256xf32>
    %c64_i32_64 = arith.constant 64 : i32
    %105 = tpu.dynamic_rotate %104 by %c64_i32_64 dim 1 : vector<1x256xf32>, i32 -> vector<1x256xf32>
    %106 = arith.addf %104, %105 : vector<1x256xf32>
    %c128_i32_65 = arith.constant 128 : i32
    %107 = tpu.dynamic_rotate %106 by %c128_i32_65 dim 1 : vector<1x256xf32>, i32 -> vector<1x256xf32>
    %108 = arith.addf %106, %107 : vector<1x256xf32>
    %cst_66 = arith.constant 3.906250e-03 : f32
    %109 = vector.broadcast %cst_66 : f32 to vector<1x256xf32>
    %110 = arith.mulf %108, %109 : vector<1x256xf32>
    %cst_67 = arith.constant 9.99999974E-6 : f32
    %111 = vector.broadcast %cst_67 : f32 to vector<1x256xf32>
    %112 = arith.addf %110, %111 : vector<1x256xf32>
    %113 = math.rsqrt %112 : vector<1x256xf32>
    %114 = vector.broadcast %113 : vector<1x256xf32> to vector<16x256xf32>
    %115 = arith.mulf %97, %114 : vector<16x256xf32>
    %cst_68 = arith.constant 0.000000e+00 : f32
    %116 = vector.broadcast %cst_68 : f32 to vector<16x256xf32>
    %117 = arith.cmpf oge, %115, %116 : vector<16x256xf32>
    %118 = vector.broadcast %83 : vector<1x256xf32> to vector<16x256xf32>
    %119 = arith.mulf %118, %115 : vector<16x256xf32>
    %120 = arith.select %117, %115, %119 : vector<16x256xi1>, vector<16x256xf32>
    %c0_69 = arith.constant 0 : index
    %c0_70 = arith.constant 0 : index
    %121 = vector.load %arg6[%c0_69, %c0_70] : memref<1x128xf32, #tpu.memory_space<vmem>>, vector<1x128xf32>
    %c2_71 = arith.constant 2 : index
    %c32_72 = arith.constant 32 : index
    %122 = vector.load %arg9[%c2_71, %c32_72] : memref<20x320xf32, #tpu.memory_space<vmem>>, vector<16x256xf32>
    tpu.vector_store %arg9[%c2_71, %c32_72], %120 {strides = array<i32>} : memref<20x320xf32, #tpu.memory_space<vmem>>, vector<16x256xf32>,
    %cst_73 = arith.constant 0.000000e+00 : f32
    %123 = vector.broadcast %cst_73 : f32 to vector<16x128xf32>
    %c0_74 = arith.constant 0 : index
    %c0_75 = arith.constant 0 : index
    %124 = vector.load %arg9[%c0_74, %c0_75] : memref<20x320xf32, #tpu.memory_space<vmem>>, vector<16x320xf32>
    %125 = arith.truncf %124 : vector<16x320xf32> to vector<16x320xbf16>
    %c0_76 = arith.constant 0 : index
    %c0_77 = arith.constant 0 : index
    %c0_78 = arith.constant 0 : index
    %126 = vector.load %arg5[%c0_76, %c0_77, %c0_78] : memref<5x320x128xbf16, #tpu.memory_space<vmem>>, vector<1x320x128xbf16>
    %127 = vector.shape_cast %126 : vector<1x320x128xbf16> to vector<320x128xbf16>
    %cst_79 = arith.constant dense<0.000000e+00> : vector<16x128xf32>
    %128 = tpu.matmul %125, %127, %cst_79 {dimension_numbers = #tpu.dot_dimension_numbers<[1], [0], [0], [1], [0, 0, 1, 1], [], []>} : vector<16x320xbf16>, vector<320x128xbf16>, vector<16x128xf32> -> vector<16x128xf32>
    %129 = arith.addf %123, %128 : vector<16x128xf32>
    %c1_80 = arith.constant 1 : index
    %c0_81 = arith.constant 0 : index
    %130 = vector.load %arg9[%c1_80, %c0_81] : memref<20x320xf32, #tpu.memory_space<vmem>>, vector<16x320xf32>
    %131 = arith.truncf %130 : vector<16x320xf32> to vector<16x320xbf16>
    %c1_82 = arith.constant 1 : index
    %c0_83 = arith.constant 0 : index
    %c0_84 = arith.constant 0 : index
    %132 = vector.load %arg5[%c1_82, %c0_83, %c0_84] : memref<5x320x128xbf16, #tpu.memory_space<vmem>>, vector<1x320x128xbf16>
    %133 = vector.shape_cast %132 : vector<1x320x128xbf16> to vector<320x128xbf16>
    %cst_85 = arith.constant dense<0.000000e+00> : vector<16x128xf32>
    %134 = tpu.matmul %131, %133, %cst_85 {dimension_numbers = #tpu.dot_dimension_numbers<[1], [0], [0], [1], [0, 0, 1, 1], [], []>} : vector<16x320xbf16>, vector<320x128xbf16>, vector<16x128xf32> -> vector<16x128xf32>
    %135 = arith.addf %129, %134 : vector<16x128xf32>
    %c2_86 = arith.constant 2 : index
    %c0_87 = arith.constant 0 : index
    %136 = vector.load %arg9[%c2_86, %c0_87] : memref<20x320xf32, #tpu.memory_space<vmem>>, vector<16x320xf32>
    %137 = arith.truncf %136 : vector<16x320xf32> to vector<16x320xbf16>
    %c2_88 = arith.constant 2 : index
    %c0_89 = arith.constant 0 : index
    %c0_90 = arith.constant 0 : index
    %138 = vector.load %arg5[%c2_88, %c0_89, %c0_90] : memref<5x320x128xbf16, #tpu.memory_space<vmem>>, vector<1x320x128xbf16>
    %139 = vector.shape_cast %138 : vector<1x320x128xbf16> to vector<320x128xbf16>
    %cst_91 = arith.constant dense<0.000000e+00> : vector<16x128xf32>
    %140 = tpu.matmul %137, %139, %cst_91 {dimension_numbers = #tpu.dot_dimension_numbers<[1], [0], [0], [1], [0, 0, 1, 1], [], []>} : vector<16x320xbf16>, vector<320x128xbf16>, vector<16x128xf32> -> vector<16x128xf32>
    %141 = arith.addf %135, %140 : vector<16x128xf32>
    %c3_92 = arith.constant 3 : index
    %c0_93 = arith.constant 0 : index
    %142 = vector.load %arg9[%c3_92, %c0_93] : memref<20x320xf32, #tpu.memory_space<vmem>>, vector<16x320xf32>
    %143 = arith.truncf %142 : vector<16x320xf32> to vector<16x320xbf16>
    %c3_94 = arith.constant 3 : index
    %c0_95 = arith.constant 0 : index
    %c0_96 = arith.constant 0 : index
    %144 = vector.load %arg5[%c3_94, %c0_95, %c0_96] : memref<5x320x128xbf16, #tpu.memory_space<vmem>>, vector<1x320x128xbf16>
    %145 = vector.shape_cast %144 : vector<1x320x128xbf16> to vector<320x128xbf16>
    %cst_97 = arith.constant dense<0.000000e+00> : vector<16x128xf32>
    %146 = tpu.matmul %143, %145, %cst_97 {dimension_numbers = #tpu.dot_dimension_numbers<[1], [0], [0], [1], [0, 0, 1, 1], [], []>} : vector<16x320xbf16>, vector<320x128xbf16>, vector<16x128xf32> -> vector<16x128xf32>
    %147 = arith.addf %141, %146 : vector<16x128xf32>
    %c4_98 = arith.constant 4 : index
    %c0_99 = arith.constant 0 : index
    %148 = vector.load %arg9[%c4_98, %c0_99] : memref<20x320xf32, #tpu.memory_space<vmem>>, vector<16x320xf32>
    %149 = arith.truncf %148 : vector<16x320xf32> to vector<16x320xbf16>
    %c4_100 = arith.constant 4 : index
    %c0_101 = arith.constant 0 : index
    %c0_102 = arith.constant 0 : index
    %150 = vector.load %arg5[%c4_100, %c0_101, %c0_102] : memref<5x320x128xbf16, #tpu.memory_space<vmem>>, vector<1x320x128xbf16>
    %151 = vector.shape_cast %150 : vector<1x320x128xbf16> to vector<320x128xbf16>
    %cst_103 = arith.constant dense<0.000000e+00> : vector<16x128xf32>
    %152 = tpu.matmul %149, %151, %cst_103 {dimension_numbers = #tpu.dot_dimension_numbers<[1], [0], [0], [1], [0, 0, 1, 1], [], []>} : vector<16x320xbf16>, vector<320x128xbf16>, vector<16x128xf32> -> vector<16x128xf32>
    %153 = arith.addf %147, %152 : vector<16x128xf32>
    %154 = vector.broadcast %121 : vector<1x128xf32> to vector<16x128xf32>
    %155 = arith.addf %153, %154 : vector<16x128xf32>
    %c0_104 = arith.constant 0 : index
    %c0_105 = arith.constant 0 : index
    %c0_106 = arith.constant 0 : index
    %156 = vector.load %arg8[%c0_104, %c0_105, %c0_106] : memref<1x16x128xf32, #tpu.memory_space<vmem>>, vector<1x16x128xf32>
    %157 = vector.shape_cast %156 : vector<1x16x128xf32> to vector<16x128xf32>
    %158 = vector.shape_cast %155 : vector<16x128xf32> to vector<1x16x128xf32>
    tpu.vector_store %arg8[%c0_104, %c0_105, %c0_106], %158 {strides = array<i32>} : memref<1x16x128xf32, #tpu.memory_space<vmem>>, vector<1x16x128xf32>,
    return
  }
  func.func @transform_0(%arg0: i32) -> (i32, i32, i32) {
    %c0_i32 = arith.constant 0 : i32
    %c0_i32_0 = arith.constant 0 : i32
    %c0_i32_1 = arith.constant 0 : i32
    return %arg0, %c0_i32, %c0_i32_0 : i32, i32, i32
  }
  func.func @transform_1(%arg0: i32) -> (i32, i32, i32) {
    %c0_i32 = arith.constant 0 : i32
    %c0_i32_0 = arith.constant 0 : i32
    %c0_i32_1 = arith.constant 0 : i32
    %c0_i32_2 = arith.constant 0 : i32
    return %c0_i32, %c0_i32_0, %c0_i32_1 : i32, i32, i32
  }
  func.func @transform_2(%arg0: i32) -> (i32, i32) {
    %c0_i32 = arith.constant 0 : i32
    %c0_i32_0 = arith.constant 0 : i32
    %c0_i32_1 = arith.constant 0 : i32
    return %c0_i32, %c0_i32_0 : i32, i32
  }
  func.func @transform_3(%arg0: i32) -> (i32, i32) {
    %c0_i32 = arith.constant 0 : i32
    %c0_i32_0 = arith.constant 0 : i32
    %c0_i32_1 = arith.constant 0 : i32
    return %c0_i32, %c0_i32_0 : i32, i32
  }
  func.func @transform_4(%arg0: i32) -> (i32, i32, i32) {
    %c0_i32 = arith.constant 0 : i32
    %c0_i32_0 = arith.constant 0 : i32
    %c0_i32_1 = arith.constant 0 : i32
    %c0_i32_2 = arith.constant 0 : i32
    return %c0_i32, %c0_i32_0, %c0_i32_1 : i32, i32, i32
  }
  func.func @transform_5(%arg0: i32) -> (i32, i32) {
    %c0_i32 = arith.constant 0 : i32
    %c0_i32_0 = arith.constant 0 : i32
    %c0_i32_1 = arith.constant 0 : i32
    return %c0_i32, %c0_i32_0 : i32, i32
  }
  func.func @transform_6(%arg0: i32) -> (i32, i32) {
    %c0_i32 = arith.constant 0 : i32
    %c0_i32_0 = arith.constant 0 : i32
    %c0_i32_1 = arith.constant 0 : i32
    return %c0_i32, %c0_i32_0 : i32, i32
  }
  func.func @transform_7(%arg0: i32) -> (i32, i32, i32) {
    %c0_i32 = arith.constant 0 : i32
    %c0_i32_0 = arith.constant 0 : i32
    %c0_i32_1 = arith.constant 0 : i32
    return %arg0, %c0_i32, %c0_i32_0 : i32, i32, i32
  }
}

</mosaic_0001>

<bundles_post_ra>
// kernel: unet_up_block.1
= control target key start
LH: loop header
LB: loop body
LE: loop exit
PB: predicated region body
PF: predicated region fallthrough
CT: control target
= control target key end

     0   :  { %s5342_s24 = smov 0   ;;  %s6587_s0 = inlined_call_operand.vmem [shape: f32[2,16,256], index: 0, kind: input, shape index: {}]   ;;  %s6588_s1 = inlined_call_operand.vmem [shape: bf16[5,320,256], index: 1, kind: input, shape index: {}]   ;;  %s6589_s2 = inlined_call_operand.vmem [shape: f32[1,256], index: 2, kind: input, shape index: {}]   ;;  %s6590_s3 = inlined_call_operand.vmem [shape: f32[1,256], index: 3, kind: input, shape index: {}]   ;;  %s6591_s4 = inlined_call_operand.vmem [shape: bf16[5,320,128], index: 4, kind: input, shape index: {}]   ;;  %s6592_s5 = inlined_call_operand.vmem [shape: f32[1,128], index: 5, kind: input, shape index: {}]   ;;  %s6593_s6 = inlined_call_operand.vmem [shape: f32[1,256], index: 6, kind: input, shape index: {}]   ;;  %s6594_s7 = inlined_call_operand.vmem [shape: f32[2,16,128], index: 7, kind: output, shape index: {}]  }
   0x1 LB: > { %s3998_s25 = sadd.s32 4294967295, %s5294_s24   ;;  %p4002_p0 = scmp.ge.s32.totalorder %s5294_s24, 1  ;;  %s5294_s24 = sphi %s5342_s24, %s17_s24  }
   0x2   : > { %p237_p1 = scmp.lt.s32.totalorder %s5294_s24, 3 }
   0x4   : > { %p238_p2 = pnand %p4002_p0, %p237_p1 }
   0x5   : > { %p269_p3 = scmp.lt.s32.totalorder (!%p238_p2), %s3998_s25, 1  ;;  %s5296_s30 = smov (!%p238_p2), 16   ;;  %v323_v18 = vlaneseq (!%p238_p2)  ;;  %vm288_vm3 = vcmask (!%p238_p2), 261122   ;;  %vm294_vm4 = vcmask (!%p238_p2), 523522   ;;  %vm290_vm5 = vcmask (!%p238_p2), 261120  }
   0x6   : > { %241 = sbr.rel (%p238_p2) target bundleno = 2743 (0xab7), region = 48  ;;  %s5297_s8 = smov (!%p238_p2), 32   ;;  %vm296_vm6 = vcmask (!%p238_p2), 523520   ;;  %vm282_vm7 = vcmask (!%p238_p2), 517120   ;;  %vm292_vm8 = vcmask (!%p238_p2), 254976   ;;  %vm298_vm9 = vcmask (!%p238_p2), 517376  }
   0x7   : > { %v5358_v19 = vand.u32 (!%p238_p2), 127, %v323_v18  ;;  %s5298_s9 = smov (!%p238_p2), 64   ;;  %v5375_v32 = vshrl.u32 (!%p238_p2), %v323_v18, 7  ;;  %v4892_v18 = vld [vmem:[%s6588_s1 + $0x10] ss:$8 sps:$4 sm:$0xff] (!%p238_p2)   ;;  %vm440_vm14 = vcmask (!%p238_p2), 1041408  }
   0x8   : > { %vm286_vm15 = vcmask (!%p238_p2), 519170  }
   0x9   : > { %vm325_vm0 = vcmp.lt.s32.totalorder (!%p238_p2), %v5358_v19, 16  ;;  %vm334_vm1 = vcmp.lt.s32.totalorder (!%p238_p2), %v5358_v19, 32  ;;  %vm343_vm2 = vcmp.lt.s32.totalorder (!%p238_p2), %v5358_v19, 64  ;;  %v5382_v39 = vsub.s32 (!%p238_p2), 0, %v5375_v32 }
   0xd   : > { %s6596_s25 = smov (!%p269_p3, %s3998_s25), 1 }
   0xe   : > { %s4640_s26 = sshll.u32 %s6596_s25, 5 }
   0xf   : > { %s273_s29 = scalar_lea.vmem %s6587_s0, %s4640_s26 }
  0x10   : > { %v300_v0 = vld [vmem:[%s273_s29] sm:$0xff]  ;;  %v302_v1 = vld [vmem:[%s273_s29 + $0x10] sm:$0xff]  ;;  %v301_v2 = vld [vmem:[%s273_s29 + $0x8] sm:$0xff] }
  0x11   : > { %v305_v3 = vadd.f32 %v302_v1, %v300_v0  ;;  %v303_v4 = vld [vmem:[%s273_s29 + $0x18] sm:$0xff] }
  0x12   : > { %v312_v5 = vadd.f32 %v303_v4, %v301_v2 }
  0x13   : > { %v306_v6 = vrot.slane %v305_v3, 4 }
  0x14   : > { %v313_v7 = vrot.slane %v312_v5, 4 }
  0x15   : > { %v307_v8 = vadd.f32 %v306_v6, %v305_v3 }
  0x16   : > { %v314_v9 = vadd.f32 %v313_v7, %v312_v5 }
  0x17   : > { %v308_v10 = vrot.slane %v307_v8, 2 }
  0x18   : > { %v315_v11 = vrot.slane %v314_v9, 2 }
  0x19   : > { %v309_v12 = vadd.f32 %v308_v10, %v307_v8 }
  0x1a   : > { %v316_v13 = vadd.f32 %v315_v11, %v314_v9 }
  0x1b   : > { %v310_v14 = vrot.slane %v309_v12, 1 }
  0x1c   : > { %v317_v15 = vrot.slane %v316_v13, 1 }
  0x1d   : > { %v311_v16 = vadd.f32 %v310_v14, %v309_v12  ;;  %v4889_v14 = vld [vmem:[%s6588_s1] ss:$8 sps:$4 sm:$0xff]  }
  0x1e   : > { %v318_v17 = vadd.f32 %v317_v15, %v316_v13  ;;  %v4887_v13 = vld [vmem:[%s6588_s1 + $0x4] ss:$8 sps:$4 sm:$0xff]   ;;  %v4890_v15 = vld [vmem:[%s6588_s1 + $0x14] ss:$8 sps:$4 sm:$0xff]  }
  0x1f   : > { %319 = vrot.lane.b32.xlu0 %v311_v16, %s5296_s30  ;;  %1117 = vmatprep.subr.bf16.mxu0 %v4887_v13  ;;  %v516_v13 = vld [vmem:[%s6588_s1 + $0xc0] sm:$0xff] }
  0x20   : > { %1118 = vmatpush1.bf16.msra.mxu0 %v4889_v14  ;;  %v517_v14 = vld [vmem:[%s6588_s1 + $0xc8] sm:$0xff] }
  0x21   : > { %1119 = vmatprep.subr.bf16.mxu0 %v4890_v15  ;;  %v4112_v15 = vcombine.low %v516_v13, %v517_v14 }
  0x23   : > { %321 = vrot.lane.b32.xlu0 %v318_v17, %s5296_s30 }
  0x24   : > { %1120 = vmatpush1.bf16.msra.mxu0 %v4892_v18  ;;  %v519_v18 = vld [vmem:[%s6588_s1 + $0xd8] sm:$0xff] }
  0x91   : > { %v320_v20 = vpop.permute.xlu0 %319 }
  0x95   : > { %v322_v21 = vpop.permute.xlu0 %321 }
  0x96   : > { %v327_v22 = vsel %vm325_vm0, %v322_v21, %v320_v20  ;;  %v326_v24 = vsel %vm325_vm0, %v320_v20, %v322_v21  ;;  %v4901_v20 = vld [vmem:[%s6588_s1 + $0x154] ss:$8 sps:$4 sm:$0xff]   ;;  %v4893_v21 = vld [vmem:[%s6588_s1 + $0x24] ss:$8 sps:$4 sm:$0xff]  }
  0x97   : > { %v328_v23 = vadd.f32 %v327_v22, %v311_v16  ;;  %v329_v25 = vadd.f32 %v326_v24, %v318_v17  ;;  %v4895_v16 = vld [vmem:[%s6588_s1 + $0x144] ss:$8 sps:$4 sm:$0xff]   ;;  %v4898_v17 = vld [vmem:[%s6588_s1 + $0x140] ss:$8 sps:$4 sm:$0xff]   ;;  %v4904_v22 = vld [vmem:[%s6588_s1 + $0x150] ss:$8 sps:$4 sm:$0xff]   ;;  %1121 = vmatprep.subr.bf16.mxu0 %v4893_v21 }
  0x98   : > { %828 = vmatprep.subr.bf16.mxu1 %v4895_v16  ;;  %v4897_v24 = vld [vmem:[%s6588_s1 + $0x20] ss:$8 sps:$4 sm:$0xff]   ;;  %v4955_v16 = vld [vmem:[%s6588_s1 + $0x1e4] ss:$8 sps:$4 sm:$0xff]  }
  0x99   : > { %330 = vrot.lane.b32.xlu1 %v328_v23, %s5297_s8  ;;  %829 = vmatpush1.bf16.msra.mxu1 %v4898_v17  ;;  %v518_v17 = vld [vmem:[%s6588_s1 + $0xd0] sm:$0xff] }
  0x9a   : > { %830 = vmatprep.subr.bf16.mxu1 %v4901_v20  ;;  %1122 = vmatpush1.bf16.msra.mxu0 %v4897_v24  ;;  %v304_v20 = vld [vmem:[%s6590_s3] sm:$0x3]  ;;  %v4114_v21 = vcombine.low %v518_v17, %v519_v18 }
  0x9d   : > { %332 = vrot.lane.b32.xlu1 %v329_v25, %s5297_s8  ;;  %831 = vmatpush1.bf16.msra.mxu1 %v4904_v22 }
 0x10b   : > { %v331_v26 = vpop.permute.xlu1 %330 }
 0x10f   : > { %v333_v27 = vpop.permute.xlu1 %332 }
 0x110   : > { %v335_v28 = vsel %vm334_vm1, %v331_v26, %v333_v27  ;;  %v336_v29 = vsel %vm334_vm1, %v333_v27, %v331_v26  ;;  %v4910_v26 = vld [vmem:[%s6588_s1 + $0x160] ss:$8 sps:$4 sm:$0xff]   ;;  %v4913_v27 = vld [vmem:[%s6588_s1 + $0x174] ss:$8 sps:$4 sm:$0xff]  }
 0x111   : > { %v337_v30 = vadd.f32 %v336_v29, %v328_v23  ;;  %v338_v31 = vadd.f32 %v335_v28, %v329_v25  ;;  %v4907_v23 = vld [vmem:[%s6588_s1 + $0x164] ss:$8 sps:$4 sm:$0xff]   ;;  %v4899_v25 = vld [vmem:[%s6588_s1 + $0x34] ss:$8 sps:$4 sm:$0xff]   ;;  %v4903_v28 = vld [vmem:[%s6588_s1 + $0x30] ss:$8 sps:$4 sm:$0xff]  }
 0x112   : > { %832 = vmatprep.subr.bf16.mxu1 %v4907_v23  ;;  %1123 = vmatprep.subr.bf16.mxu0 %v4899_v25  ;;  %v4905_v29 = vld [vmem:[%s6588_s1 + $0x44] ss:$8 sps:$4 sm:$0xff]   ;;  %v4960_v23 = vld [vmem:[%s6588_s1 + $0x1f4] ss:$8 sps:$4 sm:$0xff]  }
 0x113   : > { %339 = vrot.lane.b32.xlu0 %v337_v30, %s5298_s9  ;;  %341 = vrot.lane.b32.xlu1 %v338_v31, %s5298_s9 }
 0x114   : > { %833 = vmatpush1.bf16.msra.mxu1 %v4910_v26  ;;  %1124 = vmatpush1.bf16.msra.mxu0 %v4903_v28  ;;  %v420_v26 = vrot.slane %v304_v20, %v5382_v39  ;;  %v520_v28 = vld [vmem:[%s6588_s1 + $0xe0] sm:$0xff] }
 0x115   : > { %834 = vmatprep.subr.bf16.mxu1 %v4913_v27  ;;  %1125 = vmatprep.subr.bf16.mxu0 %v4905_v29  ;;  %v4962_v27 = vld [vmem:[%s6588_s1 + $0x1f0] ss:$8 sps:$4 sm:$0xff]   ;;  %v521_v29 = vld [vmem:[%s6588_s1 + $0xe8] sm:$0xff] }
 0x185   : > { %v340_v33 = vpop.permute.xlu0 %339  ;;  %v342_v34 = vpop.permute.xlu1 %341 }
 0x186   : > { %v344_v35 = vsel %vm343_vm2, %v340_v33, %v342_v34  ;;  %v345_v36 = vsel %vm343_vm2, %v342_v34, %v340_v33  ;;  %v4909_v33 = vld [vmem:[%s6588_s1 + $0x40] ss:$8 sps:$4 sm:$0xff]   ;;  %v5299_v34 = vmov 0.0  }
 0x187   : > { %v346_v37 = vadd.f32 %v345_v36, %v337_v30  ;;  %v347_v38 = vadd.f32 %v344_v35, %v338_v31  ;;  %v4916_v30 = vld [vmem:[%s6588_s1 + $0x170] ss:$8 sps:$4 sm:$0xff]   ;;  %v4919_v31 = vld [vmem:[%s6588_s1 + $0x184] ss:$8 sps:$4 sm:$0xff]   ;;  %280 = vst [vmem:[#allocation2] sm:$0x3] %v5299_v34  ;;  %1126 = vmatpush1.bf16.msra.mxu0 %v4909_v33 }
 0x188   : > { %281 = vst [vmem:[#allocation2 + $0x8] sm:$0x3] %v5299_v34  ;;  %284 = vst [vmem:[#allocation2 + $0x30] sm:$0xc] %v5299_v34  ;;  %v4911_v35 = vld [vmem:[%s6588_s1 + $0x54] ss:$8 sps:$4 sm:$0xff]   ;;  %835 = vmatpush1.bf16.msra.mxu1 %v4916_v30 }
 0x189   : > { %v348_v40 = vadd.f32 %v347_v38, %v346_v37  ;;  %285 = vst [vmem:[#allocation2 + $0x38] sm:$0xc] %v5299_v34  ;;  %v4922_v36 = vld [vmem:[%s6588_s1 + $0x180] ss:$8 sps:$4 sm:$0xff]   ;;  %295 = vst.msk [vmem:[#allocation2 + $0x10] sm:$0xfc] %vm294_vm4, %v5299_v34  ;;  %836 = vmatprep.subr.bf16.mxu1 %v4919_v31  ;;  %1127 = vmatprep.subr.bf16.mxu0 %v4911_v35  ;;  %v4116_v31 = vcombine.low %v520_v28, %v521_v29 }
 0x18a   : > { %289 = vst.msk [vmem:[#allocation2] sm:$0xfc] %vm288_vm3, %v5299_v34  ;;  %v4925_v37 = vld [vmem:[%s6588_s1 + $0x194] ss:$8 sps:$4 sm:$0xff]   ;;  %v4915_v38 = vld [vmem:[%s6588_s1 + $0x50] ss:$8 sps:$4 sm:$0xff]  }
 0x18b   : > { %v349_v41 = vmul.f32 0.00390625, %v348_v40  ;;  %v4917_v40 = vld [vmem:[%s6588_s1 + $0x64] ss:$8 sps:$4 sm:$0xff]   ;;  %1128 = vmatpush1.bf16.msra.mxu0 %v4915_v38  ;;  %291 = vst.msk [vmem:[#allocation2 + $0x18] sm:$0xff] %vm290_vm5, %v5299_v34  ;;  %vm471_vm4 = vcmask 1047810  }
 0x18c   : > { %837 = vmatpush1.bf16.msra.mxu1 %v4922_v36  ;;  %1129 = vmatprep.subr.bf16.mxu0 %v4917_v40  ;;  %297 = vst.msk [vmem:[#allocation2 + $0x28] sm:$0xff] %vm296_vm6, %v5299_v34  ;;  %v4963_v30 = vld [vmem:[%s6588_s1 + $0xe4] ss:$8 sps:$4 sm:$0xff]   ;;  %vm475_vm6 = vcmask 1047808  }
 0x18d   : > { %v353_v42 = vrot.slane %v349_v41, %v5382_v39  ;;  %v4928_v41 = vld [vmem:[%s6588_s1 + $0x190] ss:$8 sps:$4 sm:$0xff]   ;;  %838 = vmatprep.subr.bf16.mxu1 %v4925_v37  ;;  %283 = vst.msk [vmem:[#allocation2 + $0x10] sm:$0x3] %vm282_vm7, %v5299_v34  ;;  %v4965_v38 = vld [vmem:[%s6588_s1 + $0x204] ss:$8 sps:$4 sm:$0xff]  }
 0x18e   : > { %293 = vst.msk [vmem:[#allocation2 + $0x30] sm:$0x3] %vm292_vm8, %v5299_v34  ;;  %vm479_vm7 = vcmask 1041664  }
 0x18f   : > { %v5385_v43 = vsub.f32 %v301_v2, %v353_v42  ;;  %v5387_v44 = vsub.f32 %v303_v4, %v353_v42  ;;  %v5389_v45 = vsub.f32 %v300_v0, %v353_v42  ;;  %v5391_v46 = vsub.f32 %v302_v1, %v353_v42  ;;  %v4931_v42 = vld [vmem:[%s6588_s1 + $0x1a4] ss:$8 sps:$4 sm:$0xff]   ;;  %299 = vst.msk [vmem:[#allocation2 + $0x40] sm:$0x3] %vm298_vm9, %v5299_v34 }
 0x190   : > { %839 = vmatpush1.bf16.msra.mxu1 %v4928_v41  ;;  %287 = vst.msk [vmem:[#allocation2 + $0x40] sm:$0xc] %vm286_vm15, %v5299_v34  ;;  %vm585_vm9 = vsmask.f32 7424 }
 0x191   : > { %v359_v47 = vmul.f32 %v5385_v43, %v5385_v43  ;;  %v361_v48 = vmul.f32 %v5387_v44, %v5387_v44  ;;  %v358_v49 = vmul.f32 %v5389_v45, %v5389_v45  ;;  %v360_v50 = vmul.f32 %v5391_v46, %v5391_v46  ;;  %840 = vmatprep.subr.bf16.mxu1 %v4931_v42  ;;  %v4970_v42 = vld [vmem:[%s6588_s1 + $0x214] ss:$8 sps:$4 sm:$0xff]  }
 0x193   : > { %v369_v51 = vadd.f32 %v361_v48, %v359_v47  ;;  %v362_v52 = vadd.f32 %v360_v50, %v358_v49  ;;  %v4921_v47 = vld [vmem:[%s6588_s1 + $0x60] ss:$8 sps:$4 sm:$0xff]   ;;  %v4923_v48 = vld [vmem:[%s6588_s1 + $0x74] ss:$8 sps:$4 sm:$0xff]  }
 0x194   : > { %v4934_v49 = vld [vmem:[%s6588_s1 + $0x1a0] ss:$8 sps:$4 sm:$0xff]   ;;  %v4937_v50 = vld [vmem:[%s6588_s1 + $0x1b4] ss:$8 sps:$4 sm:$0xff]   ;;  %1130 = vmatpush1.bf16.msra.mxu0 %v4921_v47  ;;  %v4972_v47 = vld [vmem:[%s6588_s1 + $0xf0] ss:$8 sps:$4 sm:$0xff]  }
 0x195   : > { %v370_v53 = vrot.slane %v369_v51, 4  ;;  %v363_v54 = vrot.slane %v362_v52, 4  ;;  %1131 = vmatprep.subr.bf16.mxu0 %v4923_v48  ;;  %841 = vmatpush1.bf16.msra.mxu1 %v4934_v49 }
 0x196   : > { %842 = vmatprep.subr.bf16.mxu1 %v4937_v50  ;;  %v4973_v50 = vld [vmem:[%s6588_s1 + $0x210] ss:$8 sps:$4 sm:$0xff]  }
 0x197   : > { %v371_v55 = vadd.f32 %v370_v53, %v369_v51  ;;  %v364_v56 = vadd.f32 %v363_v54, %v362_v52  ;;  %v4927_v51 = vld [vmem:[%s6588_s1 + $0x70] ss:$8 sps:$4 sm:$0xff]   ;;  %v4929_v52 = vld [vmem:[%s6588_s1 + $0x84] ss:$8 sps:$4 sm:$0xff]  }
 0x198   : > { %v4940_v53 = vld [vmem:[%s6588_s1 + $0x1b0] ss:$8 sps:$4 sm:$0xff]   ;;  %v4943_v54 = vld [vmem:[%s6588_s1 + $0x1c4] ss:$8 sps:$4 sm:$0xff]   ;;  %1132 = vmatpush1.bf16.msra.mxu0 %v4927_v51 }
 0x199   : > { %v372_v57 = vrot.slane %v371_v55, 2  ;;  %v365_v58 = vrot.slane %v364_v56, 2  ;;  %1133 = vmatprep.subr.bf16.mxu0 %v4929_v52  ;;  %843 = vmatpush1.bf16.msra.mxu1 %v4940_v53 }
 0x19a   : > { %844 = vmatprep.subr.bf16.mxu1 %v4943_v54 }
 0x19b   : > { %v373_v59 = vadd.f32 %v372_v57, %v371_v55  ;;  %v366_v60 = vadd.f32 %v365_v58, %v364_v56  ;;  %v4933_v55 = vld [vmem:[%s6588_s1 + $0x80] ss:$8 sps:$4 sm:$0xff]   ;;  %v4935_v56 = vld [vmem:[%s6588_s1 + $0x94] ss:$8 sps:$4 sm:$0xff]  }
 0x19c   : > { %v4946_v57 = vld [vmem:[%s6588_s1 + $0x1c0] ss:$8 sps:$4 sm:$0xff]   ;;  %v4949_v58 = vld [vmem:[%s6588_s1 + $0x1d4] ss:$8 sps:$4 sm:$0xff]   ;;  %1134 = vmatpush1.bf16.msra.mxu0 %v4933_v55  ;;  %v4976_v55 = vld [vmem:[%s6588_s1 + $0x104] ss:$8 sps:$4 sm:$0xff]  }
 0x19d   : > { %v374_v61 = vrot.slane %v373_v59, 1  ;;  %v367_v62 = vrot.slane %v366_v60, 1  ;;  %1135 = vmatprep.subr.bf16.mxu0 %v4935_v56  ;;  %845 = vmatpush1.bf16.msra.mxu1 %v4946_v57 }
 0x19e   : > { %846 = vmatprep.subr.bf16.mxu1 %v4949_v58  ;;  %v4977_v58 = vld [vmem:[%s6588_s1 + $0x224] ss:$8 sps:$4 sm:$0xff]  }
 0x19f   : > { %v375_v63 = vadd.f32 %v374_v61, %v373_v59  ;;  %v368_v0 = vadd.f32 %v367_v62, %v366_v60  ;;  %v4939_v59 = vld [vmem:[%s6588_s1 + $0x90] ss:$8 sps:$4 sm:$0xff]   ;;  %v4941_v60 = vld [vmem:[%s6588_s1 + $0xa4] ss:$8 sps:$4 sm:$0xff]   ;;  %v4945_v62 = vld [vmem:[%s6588_s1 + $0xa0] ss:$8 sps:$4 sm:$0xff]  }
 0x1a0   : > { %v4952_v61 = vld [vmem:[%s6588_s1 + $0x1d0] ss:$8 sps:$4 sm:$0xff]   ;;  %1136 = vmatpush1.bf16.msra.mxu0 %v4939_v59  ;;  %v4979_v59 = vld [vmem:[%s6588_s1 + $0x220] ss:$8 sps:$4 sm:$0xff]  }
 0x1a1   : > { %378 = vrot.lane.b32.xlu1 %v375_v63, %s5296_s30  ;;  %376 = vrot.lane.b32.xlu0 %v368_v0, %s5296_s30 }
 0x1a2   : > { %1137 = vmatprep.subr.bf16.mxu0 %v4941_v60  ;;  %847 = vmatpush1.bf16.msra.mxu1 %v4952_v61 }
 0x1a3   : > { %848 = vmatprep.subr.bf16.mxu1 %v4955_v16  ;;  %v4974_v16 = vld [vmem:[%s6588_s1 + $0x100] ss:$8 sps:$4 sm:$0xff]  }
 0x1a4   : > { %1138 = vmatpush1.bf16.msra.mxu0 %v4945_v62  ;;  %v4983_v62 = vld [vmem:[%s6588_s1 + $0x234] ss:$8 sps:$4 sm:$0xff]  }
 0x213   : > { %v379_v1 = vpop.permute.xlu1 %378  ;;  %v377_v2 = vpop.permute.xlu0 %376 }
 0x214   : > { %v380_v3 = vsel %vm325_vm0, %v377_v2, %v379_v1  ;;  %v381_v4 = vsel %vm325_vm0, %v379_v1, %v377_v2  ;;  %v4953_v1 = vld [vmem:[%s6588_s1 + $0xc4] ss:$8 sps:$4 sm:$0xff]  }
 0x215   : > { %v382_v5 = vadd.f32 %v381_v4, %v368_v0  ;;  %v383_v6 = vadd.f32 %v380_v3, %v375_v63  ;;  %v4947_v63 = vld [vmem:[%s6588_s1 + $0xb4] ss:$8 sps:$4 sm:$0xff]   ;;  %v4951_v0 = vld [vmem:[%s6588_s1 + $0xb0] ss:$8 sps:$4 sm:$0xff]  }
 0x216   : > { %1139 = vmatprep.subr.bf16.mxu0 %v4947_v63  ;;  %v4985_v63 = vld [vmem:[%s6588_s1 + $0x230] ss:$8 sps:$4 sm:$0xff]  }
 0x217   : > { %384 = vrot.lane.b32.xlu0 %v382_v5, %s5297_s8  ;;  %386 = vrot.lane.b32.xlu1 %v383_v6, %s5297_s8 }
 0x218   : > { %1140 = vmatpush1.bf16.msra.mxu0 %v4951_v0  ;;  %v4991_v0 = vld [vmem:[%s6588_s1 + $0x244] ss:$8 sps:$4 sm:$0xff]  }
 0x219   : > { %1141 = vmatprep.subr.bf16.mxu0 %v4953_v1 }
 0x21c   : > { %1142 = vmatpush1.bf16.msra.mxu0 %v4112_v15 }
 0x289   : > { %v385_v7 = vpop.permute.xlu0 %384  ;;  %v387_v8 = vpop.permute.xlu1 %386 }
 0x28a   : > { %v388_v9 = vsel %vm334_vm1, %v385_v7, %v387_v8  ;;  %v389_v10 = vsel %vm334_vm1, %v387_v8, %v385_v7 }
 0x28b   : > { %v5413_v11 = vadd.f32 %v389_v10, %v382_v5  ;;  %v5415_v12 = vadd.f32 %v388_v9, %v383_v6 }
 0x28d   : > { %392 = vrot.lane.b32.xlu0 %v5413_v11, %s5298_s9  ;;  %394 = vrot.lane.b32.xlu1 %v5415_v12, %s5298_s9 }
 0x2ff   : > { %v393_v2 = vpop.permute.xlu0 %392  ;;  %v395_v3 = vpop.permute.xlu1 %394 }
 0x300   : > { %v396_v4 = vsel %vm343_vm2, %v393_v2, %v395_v3  ;;  %v397_v5 = vsel %vm343_vm2, %v395_v3, %v393_v2 }
 0x301   : > { %v398_v6 = vadd.f32 %v397_v5, %v5413_v11  ;;  %v399_v7 = vadd.f32 %v396_v4, %v5415_v12  ;;  %v5579_v11 = vsub.s32 1, %v5375_v32  ;;  %v4957_v12 = vld [vmem:[%s6588_s1 + $0x1e0] ss:$8 sps:$4 sm:$0xff]   ;;  %v4958_v32 = vld [vmem:[%s6588_s1 + $0xd4] ss:$8 sps:$4 sm:$0xff]  }
 0x302   : > { %849 = vmatpush1.bf16.msra.mxu1 %v4957_v12  ;;  %1143 = vmatprep.subr.bf16.mxu0 %v4958_v32  ;;  %v4982_v32 = vld [vmem:[%s6588_s1 + $0x114] ss:$8 sps:$4 sm:$0xff]  }
 0x303   : > { %v400_v8 = vadd.f32 %v399_v7, %v398_v6  ;;  %v424_v25 = vrot.slane %v304_v20, %v5579_v11  ;;  %1144 = vmatpush1.bf16.msra.mxu0 %v4114_v21  ;;  %850 = vmatprep.subr.bf16.mxu1 %v4960_v23 }
 0x304   : > { %1145 = vmatprep.subr.bf16.mxu0 %v4963_v30 }
 0x305   : > { %v401_v9 = vmul.f32 0.00390625, %v400_v8 }
 0x306   : > { %851 = vmatpush1.bf16.msra.mxu1 %v4962_v27  ;;  %v4988_v27 = vld [vmem:[%s6588_s1 + $0x124] ss:$8 sps:$4 sm:$0xff]  }
 0x307   : > { %v402_v10 = vadd.f32 1e-05, %v401_v9  ;;  %1146 = vmatpush1.bf16.msra.mxu0 %v4116_v31  ;;  %852 = vmatprep.subr.bf16.mxu1 %v4965_v38 }
 0x309   : > { %5284 = vrsqrt.f32 %v402_v10 }
 0x313   : > { %v5285_v22 = vpop.eup %5284 }
 0x314   : > { %v407_v24 = vrot.slane %v5285_v22, %v5382_v39 }
 0x316   : > { %v409_v33 = vmul.f32 %v407_v24, %v5385_v43  ;;  %v408_v35 = vmul.f32 %v407_v24, %v5389_v45  ;;  %v411_v36 = vmul.f32 %v407_v24, %v5387_v44  ;;  %v410_v37 = vmul.f32 %v407_v24, %v5391_v46  ;;  %v4967_v43 = vld [vmem:[%s6588_s1 + $0x200] ss:$8 sps:$4 sm:$0xff]   ;;  %v4968_v44 = vld [vmem:[%s6588_s1 + $0xf4] ss:$8 sps:$4 sm:$0xff]   ;;  %v4980_v24 = vld [vmem:[%s6588_s1 + $0x110] ss:$8 sps:$4 sm:$0xff]  }
 0x317   : > { %853 = vmatpush1.bf16.msra.mxu1 %v4967_v43  ;;  %1147 = vmatprep.subr.bf16.mxu0 %v4968_v44  ;;  %v4994_v43 = vld [vmem:[%s6588_s1 + $0x134] ss:$8 sps:$4 sm:$0xff]  }
 0x318   : > { %vm413_vm10 = vcmp.ge.f32.partialorder %v409_v33, 0.0  ;;  %v428_v40 = vmul.f32 %v424_v25, %v409_v33  ;;  %vm412_vm11 = vcmp.ge.f32.partialorder %v408_v35, 0.0  ;;  %v427_v41 = vmul.f32 %v420_v26, %v408_v35  ;;  %854 = vmatprep.subr.bf16.mxu1 %v4970_v42  ;;  %1148 = vmatpush1.bf16.msra.mxu0 %v4972_v47  ;;  %v4989_v42 = vld [vmem:[%s6588_s1 + $0x240] ss:$8 sps:$4 sm:$0xff]  }
 0x319   : > { %vm415_vm12 = vcmp.ge.f32.partialorder %v411_v36, 0.0  ;;  %v430_v45 = vmul.f32 %v424_v25, %v411_v36  ;;  %vm414_vm13 = vcmp.ge.f32.partialorder %v410_v37, 0.0  ;;  %v429_v46 = vmul.f32 %v420_v26, %v410_v37  ;;  %1160 = vmatprep.subr.bf16.mxu0 %v4976_v55  ;;  %v5000_v55 = vld [vmem:[%s6588_s1 + $0x284] ss:$8 sps:$4 sm:$0xff]  }
 0x31a   : > { %v432_v48 = vsel %vm413_vm10, %v409_v33, %v428_v40  ;;  %v431_v49 = vsel %vm412_vm11, %v408_v35, %v427_v41  ;;  %v5300_v26 = vmov 0   ;;  %vm824_vm10 = vcmask 523264  }
 0x31b   : > { %v442_v51 = vrot.slane %v432_v48, 6  ;;  %v441_v52 = vrot.slane %v431_v49, 6  ;;  %v434_v53 = vsel %vm415_vm12, %v411_v36, %v430_v45  ;;  %v433_v54 = vsel %vm414_vm13, %v410_v37, %v429_v46  ;;  %855 = vmatpush1.bf16.msra.mxu1 %v4973_v50  ;;  %v4986_v36 = vld [vmem:[%s6588_s1 + $0x120] ss:$8 sps:$4 sm:$0xff]   ;;  %v4992_v50 = vld [vmem:[%s6588_s1 + $0x130] ss:$8 sps:$4 sm:$0xff]  }
 0x31c   : > { %v445_v56 = vrot.slane %v434_v53, 6  ;;  %v443_v57 = vrot.slane %v433_v54, 6  ;;  %856 = vmatprep.subr.bf16.mxu1 %v4977_v58  ;;  %vm1262_vm11 = vcmask 1046528   ;;  %vm1620_vm12 = vsmask.f32 6400 }
 0x31d   : > { %449 = vrot.lane.b32.xlu1 %v442_v51, %s5297_s8  ;;  %447 = vrot.lane.b32.xlu0 %v441_v52, %s5297_s8  ;;  %vm2026_vm13 = vcmask 1045504  }
 0x31e   : > { %v446_v60 = vsel %vm440_vm14, %v442_v51, %v445_v56  ;;  %v444_v61 = vsel %vm440_vm14, %v441_v52, %v443_v57  ;;  %v4997_v51 = vld [vmem:[%s6588_s1 + $0x254] ss:$8 sps:$4 sm:$0xff]  }
 0x31f   : > { %857 = vmatpush1.bf16.msra.mxu1 %v4979_v59  ;;  %v4995_v59 = vld [vmem:[%s6588_s1 + $0x250] ss:$8 sps:$4 sm:$0xff]  }
 0x320   : > { %858 = vmatprep.subr.bf16.mxu1 %v4983_v62  ;;  %v4998_v62 = vld [vmem:[%s6588_s1 + $0x280] ss:$8 sps:$4 sm:$0xff]  }
 0x321   : > { %453 = vrot.lane.b32.xlu1 %v446_v60, %s5297_s8  ;;  %451 = vrot.lane.b32.xlu0 %v444_v61, %s5297_s8 }
 0x323   : > { %859 = vmatpush1.bf16.msra.mxu1 %v4985_v63  ;;  %v5003_v63 = vld [vmem:[%s6588_s1 + $0x264] ss:$8 sps:$4 sm:$0xff]  }
 0x324   : > { %871 = vmatprep.subr.bf16.mxu1 %v4991_v0 }
 0x325   : > { %457 = vrot.lane.b32.xlu1 %v445_v56, %s5297_s8  ;;  %455 = vrot.lane.b32.xlu0 %v443_v57, %s5297_s8 }
 0x38f   : > { %v450_v1 = vpop.permute.xlu1 %449  ;;  %v448_v2 = vpop.permute.xlu0 %447 }
 0x390   : > { %474 = vst.msk [vmem:[#allocation2 + $0x10] sm:$0xfc] %vm288_vm3, %v450_v1  ;;  %v459_v3 = vsel %vm290_vm5, %v448_v2, %v450_v1 }
 0x391   : > { %472 = vst.msk [vmem:[#allocation2] sm:$0xfc] %vm471_vm4, %v448_v2  ;;  %473 = vst [vmem:[#allocation2 + $0x8] sm:$0xfc] %v459_v3  ;;  %v5006_v2 = vld [vmem:[%s6588_s1 + $0x294] ss:$8 sps:$4 sm:$0xff]  }
 0x393   : > { %v454_v4 = vpop.permute.xlu1 %453  ;;  %v452_v5 = vpop.permute.xlu0 %451 }
 0x394   : > { %478 = vst.msk [vmem:[#allocation2 + $0x28] sm:$0xff] %vm290_vm5, %v454_v4  ;;  %v5676_v8 = vsel %vm290_vm5, %v452_v5, %v454_v4 }
 0x395   : > { %476 = vst.msk [vmem:[#allocation2 + $0x18] sm:$0xff] %vm475_vm6, %v452_v5  ;;  %v5001_v5 = vld [vmem:[%s6588_s1 + $0x260] ss:$8 sps:$4 sm:$0xff]  }
 0x397   : > { %v458_v6 = vpop.permute.xlu1 %457  ;;  %v456_v7 = vpop.permute.xlu0 %455  ;;  %v534_v57 = vld [vmem:[#allocation2 + $0x10] sm:$0xfe] }
 0x398   : > { %482 = vst.msk [vmem:[#allocation2 + $0x40] sm:$0x3] %vm292_vm8, %v458_v6  ;;  %v461_v9 = vsel %vm290_vm5, %v456_v7, %v458_v6  ;;  %v484_v10 = vld [vmem:[#allocation2 + $0x8] sm:$0xff]  ;;  %v483_v12 = vld [vmem:[#allocation2] sm:$0xff]  ;;  %v485_v61 = vld [vmem:[#allocation2 + $0x10] sm:$0xff] }
 0x399   : > { %480 = vst.msk [vmem:[#allocation2 + $0x30] sm:$0x3] %vm479_vm7, %v456_v7  ;;  %v533_v13 = vld [vmem:[#allocation2 + $0x8] sm:$0xfe]  ;;  %481 = vst [vmem:[#allocation2 + $0x38] sm:$0x3] %v461_v9  ;;  %v490_v14 = vpack.c.bf16 %v5676_v8, %v484_v10 }
 0x39a   : > { %v539_v15 = vpack.c.bf16 %v5676_v8, %v533_v13  ;;  %v532_v18 = vld [vmem:[#allocation2] sm:$0xfe]  ;;  %v1204_v48 = vld [vmem:[#allocation2 + $0x8] sm:$0xfc]  ;;  %v5004_v9 = vld [vmem:[%s6588_s1 + $0x290] ss:$8 sps:$4 sm:$0xff]  }
 0x39b   : > { %1149 = vmatprep.mubr.bf16.mxu0 %v490_v14  ;;  %v5716_v52 = vld [vmem:[#allocation2 + $0x28] sm:$0xff]  ;;  %v1210_v56 = vpack.c.bf16 %v5676_v8, %v1204_v48  ;;  %v5009_v10 = vld [vmem:[%s6588_s1 + $0x274] ss:$8 sps:$4 sm:$0xff]  }
 0x39c   : > { %v5686_v17 = vld [vmem:[#allocation2 + $0x18] sm:$0xff]  ;;  %v601_v22 = vshll.u32 %v539_v15, 16  ;;  %v599_v37 = vshrl.u32 %v539_v15, 16  ;;  %v540_v60 = vpack.c.bf16 %v5716_v52, %v534_v57  ;;  %v491_v1 = vpack.c.bf16 %v5716_v52, %v485_v61  ;;  %v5012_v13 = vld [vmem:[%s6588_s1 + $0x2a4] ss:$8 sps:$4 sm:$0xff]  }
 0x39d   : > { %v489_v20 = vpack.c.bf16 %v5686_v17, %v483_v12  ;;  %v538_v21 = vpack.c.bf16 %v5686_v17, %v532_v18  ;;  %v1266_v4 = vrot.slane %v1210_v56, 1  ;;  %v5007_v15 = vld [vmem:[%s6588_s1 + $0x270] ss:$8 sps:$4 sm:$0xff]   ;;  %v5010_v12 = vld [vmem:[%s6588_s1 + $0x2a0] ss:$8 sps:$4 sm:$0xff]  }
 0x39e   : > { %v603_v31 = vrot.slane %v601_v22, 1  ;;  %v613_v6 = vshll.u32 %v540_v60, 16  ;;  %v611_v18 = vshrl.u32 %v540_v60, 16  ;;  %v5013_v22 = vld [vmem:[%s6588_s1 + $0x2b0] ss:$8 sps:$4 sm:$0xff]  }
 0x39f   : > { %1150 = vmatmul.mubr.bf16.vlgmr.msra.gmra.mrb[0].mxu0 %v489_v20  ;;  %v589_v23 = vshll.u32 %v538_v21, 16  ;;  %v587_v40 = vshrl.u32 %v538_v21, 16  ;;  %v537_v58 = vld [vmem:[#allocation2 + $0x40] sm:$0x1]  ;;  %v5048_v48 = vld [vmem:[%s6588_s1 + $0x364] ss:$8 sps:$4 sm:$0xff]  }
 0x3a0   : > { %1161 = vmatpush1.bf16.msra.mxu0 %v4974_v16  ;;  %v535_v25 = vld [vmem:[#allocation2 + $0x30] sm:$0x1]  ;;  %1192 = vmatprep.mubr.bf16.mxu0 %v5300_v26  ;;  %v536_v28 = vld [vmem:[#allocation2 + $0x38] sm:$0x1]  ;;  %v604_v45 = vor.u32 %v603_v31, %v599_v37  ;;  %v543_v3 = vpack.c.bf16 %v537_v58, %v537_v58  ;;  %v615_v16 = vrot.slane %v613_v6, 1 }
 0x3a1   : > { %1162 = vmatprep.subr.bf16.mxu0 %v4982_v32  ;;  %v541_v29 = vpack.c.bf16 %v535_v25, %v535_v25  ;;  %v542_v30 = vpack.c.bf16 %v536_v28, %v536_v28  ;;  %v591_v33 = vrot.slane %v589_v23, 1  ;;  %v1207_v44 = vld [vmem:[#allocation2 + $0x38] sm:$0x3]  ;;  %v5015_v32 = vld [vmem:[%s6588_s1 + $0x2b4] ss:$8 sps:$4 sm:$0xff]  }
 0x3a2   : > { %v1213_v53 = vpack.c.bf16 %v1207_v44, %v1207_v44  ;;  %v618_v14 = vshll.u32 %v543_v3, 16  ;;  %v616_v21 = vor.u32 %v615_v16, %v611_v18  ;;  %v5016_v25 = vld [vmem:[%s6588_s1 + $0x2c0] ss:$8 sps:$4 sm:$0xff]   ;;  %v5019_v28 = vld [vmem:[%s6588_s1 + $0x2d0] ss:$8 sps:$4 sm:$0xff]  }
 0x3a3   : > { %v594_v35 = vshll.u32 %v541_v29, 16  ;;  %v606_v38 = vshll.u32 %v542_v30, 16  ;;  %v592_v47 = vor.u32 %v591_v33, %v587_v40  ;;  %v5024_v29 = vld [vmem:[%s6588_s1 + $0x2e4] ss:$8 sps:$4 sm:$0xff]   ;;  %v5022_v30 = vld [vmem:[%s6588_s1 + $0x2e0] ss:$8 sps:$4 sm:$0xff]  }
 0x3a4   : > { %1163 = vmatpush1.bf16.msra.mxu0 %v4980_v24  ;;  %v1267_v0 = vrot.slane %v1213_v53, 1  ;;  %v620_v20 = vrot.slane %v618_v14, 1  ;;  %v5018_v24 = vld [vmem:[%s6588_s1 + $0x2c4] ss:$8 sps:$4 sm:$0xff]   ;;  %v5027_v31 = vld [vmem:[%s6588_s1 + $0x2f4] ss:$8 sps:$4 sm:$0xff]  }
 0x3a5   : > { %1164 = vmatprep.subr.bf16.mxu0 %v4988_v27  ;;  %v596_v41 = vrot.slane %v594_v35, 1  ;;  %v608_v46 = vrot.slane %v606_v38, 1  ;;  %v5021_v27 = vld [vmem:[%s6588_s1 + $0x2d4] ss:$8 sps:$4 sm:$0xff]   ;;  %v5025_v33 = vld [vmem:[%s6588_s1 + $0x2f0] ss:$8 sps:$4 sm:$0xff]  }
 0x3a6   : > { %v1268_v7 = vsel %vm1262_vm11, %v1266_v4, %v1267_v0  ;;  %v621_v23 = vsel %vm585_vm9, %v616_v21, %v620_v20  ;;  %v5030_v35 = vld [vmem:[%s6588_s1 + $0x304] ss:$8 sps:$4 sm:$0xff]   ;;  %v5033_v37 = vld [vmem:[%s6588_s1 + $0x314] ss:$8 sps:$4 sm:$0xff]   ;;  %v5031_v38 = vld [vmem:[%s6588_s1 + $0x310] ss:$8 sps:$4 sm:$0xff]  }
 0x3a7   : > { %v609_v49 = vsel %vm585_vm9, %v604_v45, %v608_v46  ;;  %v597_v54 = vsel %vm585_vm9, %v592_v47, %v596_v41  ;;  %v5036_v40 = vld [vmem:[%s6588_s1 + $0x324] ss:$8 sps:$4 sm:$0xff]   ;;  %v5034_v41 = vld [vmem:[%s6588_s1 + $0x320] ss:$8 sps:$4 sm:$0xff]   ;;  %v5037_v44 = vld [vmem:[%s6588_s1 + $0x330] ss:$8 sps:$4 sm:$0xff]  }
 0x3a8   : > { %1165 = vmatpush1.bf16.msra.mxu0 %v4986_v36  ;;  %860 = vmatprep.mubr.bf16.mxu1 %v609_v49  ;;  %v5028_v36 = vld [vmem:[%s6588_s1 + $0x300] ss:$8 sps:$4 sm:$0xff]   ;;  %v5042_v45 = vld [vmem:[%s6588_s1 + $0x344] ss:$8 sps:$4 sm:$0xff]   ;;  %v5043_v47 = vld [vmem:[%s6588_s1 + $0x350] ss:$8 sps:$4 sm:$0xff]  }
 0x3a9   : > { %1166 = vmatprep.subr.bf16.mxu0 %v4994_v43  ;;  %861 = vmatmul.mubr.bf16.vlgmr.msra.gmra.mrb[0].mxu1 %v597_v54  ;;  %v5039_v43 = vld [vmem:[%s6588_s1 + $0x334] ss:$8 sps:$4 sm:$0xff]   ;;  %v5040_v46 = vld [vmem:[%s6588_s1 + $0x340] ss:$8 sps:$4 sm:$0xff]   ;;  %v1206_v49 = vld [vmem:[#allocation2 + $0x30] sm:$0x3] }
 0x3aa   : > { %872 = vmatpush1.bf16.msra.mxu1 %v4989_v42  ;;  %903 = vmatprep.mubr.bf16.mxu1 %v5300_v26  ;;  %v5045_v42 = vld [vmem:[%s6588_s1 + $0x354] ss:$8 sps:$4 sm:$0xff]   ;;  %v1212_v53 = vpack.c.bf16 %v1206_v49, %v1206_v49  ;;  %v1203_v54 = vld [vmem:[#allocation2] sm:$0xfc]  ;;  %v1571_v61 = vld [vmem:[#allocation2 + $0x38] sm:$0x7] }
 0x3ab   : > { %873 = vmatprep.subr.bf16.mxu1 %v4997_v51  ;;  %v5051_v51 = vld [vmem:[%s6588_s1 + $0x374] ss:$8 sps:$4 sm:$0xff]   ;;  %v1209_v56 = vpack.c.bf16 %v5686_v17, %v1203_v54  ;;  %v5054_v57 = vld [vmem:[%s6588_s1 + $0x384] ss:$8 sps:$4 sm:$0xff]   ;;  %v5052_v60 = vld [vmem:[%s6588_s1 + $0x380] ss:$8 sps:$4 sm:$0xff]  }
 0x3ac   : > { %1167 = vmatpush1.bf16.msra.mxu0 %v4992_v50  ;;  %v5046_v50 = vld [vmem:[%s6588_s1 + $0x360] ss:$8 sps:$4 sm:$0xff]   ;;  %v1264_v58 = vrot.slane %v1212_v53, 1  ;;  %v5060_v3 = vld [vmem:[%s6588_s1 + $0x3a4] ss:$8 sps:$4 sm:$0xff]  }
 0x3ad   : > { %1477 = vmatprep.subr.bf16.mxu0 %v5000_v55  ;;  %v5049_v55 = vld [vmem:[%s6588_s1 + $0x370] ss:$8 sps:$4 sm:$0xff]   ;;  %v1568_v0 = vld [vmem:[#allocation2 + $0x8] sm:$0xf8] }
 0x3ae   : > { %874 = vmatpush1.bf16.msra.mxu1 %v4995_v59  ;;  %v1263_v59 = vrot.slane %v1209_v56, 1  ;;  %v1574_v4 = vpack.c.bf16 %v5676_v8, %v1568_v0  ;;  %v1205_v16 = vld [vmem:[#allocation2 + $0x10] sm:$0xfc]  ;;  %v5066_v21 = vld [vmem:[%s6588_s1 + $0x3c4] ss:$8 sps:$4 sm:$0xff]  }
 0x3af   : > { %4128 = vmatmul.mubr.msk.bf16.vlgmr.msra.gmra.mrb[0].mxu0 %vm824_vm10, %v491_v1  ;;  %875 = vmatprep.subr.bf16.mxu1 %v5003_v63  ;;  %v1577_v1 = vpack.c.bf16 %v1571_v61, %v1571_v61  ;;  %v5061_v20 = vld [vmem:[%s6588_s1 + $0x3b0] ss:$8 sps:$4 sm:$0xff]   ;;  %v5090_v49 = vld [vmem:[%s6588_s1 + $0x444] ss:$8 sps:$4 sm:$0xff]   ;;  %v5099_v56 = vld [vmem:[%s6588_s1 + $0x474] ss:$8 sps:$4 sm:$0xff]  }
 0x3b0   : > { %1478 = vmatpush1.bf16.msra.mxu0 %v4998_v62  ;;  %1509 = vmatprep.mubr.bf16.mxu0 %v1268_v7  ;;  %v5057_v62 = vld [vmem:[%s6588_s1 + $0x394] ss:$8 sps:$4 sm:$0xff]   ;;  %v1265_v63 = vsel %vm1262_vm11, %v1263_v59, %v1264_v58  ;;  %v1642_v14 = vshll.u32 %v1574_v4, 16  ;;  %v5091_v53 = vld [vmem:[%s6588_s1 + $0x450] ss:$8 sps:$4 sm:$0xff]  }
 0x3b1   : > { %1479 = vmatprep.subr.bf16.mxu0 %v5006_v2  ;;  %v5055_v2 = vld [vmem:[%s6588_s1 + $0x390] ss:$8 sps:$4 sm:$0xff]   ;;  %v1647_v6 = vshrl.u32 %v1577_v1, 16  ;;  %v1650_v7 = vshll.u32 %v1577_v1, 16  ;;  %v5096_v54 = vld [vmem:[%s6588_s1 + $0x464] ss:$8 sps:$4 sm:$0xff]  }
 0x3b2   : > { %876 = vmatpush1.bf16.msra.mxu1 %v5001_v5  ;;  %v1208_v5 = vld [vmem:[#allocation2 + $0x40] sm:$0x3]  ;;  %v5102_v58 = vld [vmem:[%s6588_s1 + $0x484] ss:$8 sps:$4 sm:$0xff]   ;;  %v1570_v59 = vld [vmem:[#allocation2 + $0x30] sm:$0x7] }
 0x3b3   : > { %877 = vmatprep.subr.bf16.mxu1 %v5009_v10  ;;  %v5063_v10 = vld [vmem:[%s6588_s1 + $0x3b4] ss:$8 sps:$4 sm:$0xff]   ;;  %v1652_v18 = vrot.slane %v1650_v7, 2  ;;  %v5103_v0 = vld [vmem:[%s6588_s1 + $0x490] ss:$8 sps:$4 sm:$0xff]  }
 0x3b4   : > { %1480 = vmatpush1.bf16.msra.mxu0 %v5004_v9  ;;  %v5058_v9 = vld [vmem:[%s6588_s1 + $0x3a0] ss:$8 sps:$4 sm:$0xff]   ;;  %v5105_v61 = vld [vmem:[%s6588_s1 + $0x494] ss:$8 sps:$4 sm:$0xff]  }
 0x3b5   : > { %1481 = vmatprep.subr.bf16.mxu0 %v5012_v13  ;;  %v1639_v13 = vshrl.u32 %v1574_v4, 16 }
 0x3b6   : > { %878 = vmatpush1.bf16.msra.mxu1 %v5007_v15  ;;  %v1214_v15 = vpack.c.bf16 %v1208_v5, %v1208_v5  ;;  %v5106_v5 = vld [vmem:[%s6588_s1 + $0x4a0] ss:$8 sps:$4 sm:$0xff]  }
 0x3b8   : > { %1482 = vmatpush1.bf16.msra.mxu0 %v5010_v12  ;;  %v1649_v12 = vrot.slane %v1647_v6, 1 }
 0x3b9   : > { %1483 = vmatprep.subr.bf16.mxu0 %v5015_v32  ;;  %4087 = vmatmul.mubr.msk.bf16.vlgmr.msra.gmra.mrb[0].mxu1 %vm824_vm10, %v621_v23  ;;  %v1211_v32 = vpack.c.bf16 %v5716_v52, %v1205_v16  ;;  %v1644_v23 = vrot.slane %v1642_v14, 2  ;;  %v5109_v14 = vld [vmem:[%s6588_s1 + $0x4b0] ss:$8 sps:$4 sm:$0xff]  }
 0x3bc   : > { %1484 = vmatpush1.bf16.msra.mxu0 %v5013_v22  ;;  %v1641_v22 = vrot.slane %v1639_v13, 1 }
 0x3bd   : > { %1485 = vmatprep.subr.bf16.mxu0 %v5018_v24  ;;  %v1270_v24 = vrot.slane %v1214_v15, 1 }
 0x3c0   : > { %1486 = vmatpush1.bf16.msra.mxu0 %v5016_v25  ;;  %v1653_v25 = vor.u32 %v1652_v18, %v1649_v12  ;;  %v5114_v12 = vld [vmem:[%s6588_s1 + $0x4c4] ss:$8 sps:$4 sm:$0xff]  }
 0x3c1   : > { %1487 = vmatprep.subr.bf16.mxu0 %v5021_v27  ;;  %v1269_v27 = vrot.slane %v1211_v32, 1 }
 0x3c4   : > { %1488 = vmatpush1.bf16.msra.mxu0 %v5019_v28  ;;  %v5064_v28 = vld [vmem:[%s6588_s1 + $0x3c0] ss:$8 sps:$4 sm:$0xff]  }
 0x3c5   : > { %1489 = vmatprep.subr.bf16.mxu0 %v5024_v29  ;;  %v1645_v29 = vor.u32 %v1644_v23, %v1641_v22  ;;  %v5117_v22 = vld [vmem:[%s6588_s1 + $0x4d4] ss:$8 sps:$4 sm:$0xff]  }
 0x3c8   : > { %1490 = vmatpush1.bf16.msra.mxu0 %v5022_v30  ;;  %v5069_v30 = vld [vmem:[%s6588_s1 + $0x3d4] ss:$8 sps:$4 sm:$0xff]  }
 0x3c9   : > { %1491 = vmatprep.subr.bf16.mxu0 %v5027_v31  ;;  %v1271_v31 = vsel %vm1262_vm11, %v1269_v27, %v1270_v24  ;;  %v5115_v27 = vld [vmem:[%s6588_s1 + $0x4d0] ss:$8 sps:$4 sm:$0xff]  }
 0x3cc   : > { %1492 = vmatpush1.bf16.msra.mxu0 %v5025_v33  ;;  %v1654_v33 = vsel %vm1620_vm12, %v1645_v29, %v1653_v25  ;;  %v1569_v25 = vld [vmem:[#allocation2 + $0x10] sm:$0xf8]  ;;  %v5120_v29 = vld [vmem:[%s6588_s1 + $0x4e4] ss:$8 sps:$4 sm:$0xff]  }
 0x3cd   : > { %1493 = vmatprep.subr.bf16.mxu0 %v5030_v35  ;;  %v5067_v35 = vld [vmem:[%s6588_s1 + $0x3d0] ss:$8 sps:$4 sm:$0xff]  }
 0x3d0   : > { %1494 = vmatpush1.bf16.msra.mxu0 %v5028_v36  ;;  %v5072_v36 = vld [vmem:[%s6588_s1 + $0x3e4] ss:$8 sps:$4 sm:$0xff]  }
 0x3d1   : > { %1495 = vmatprep.subr.bf16.mxu0 %v5033_v37  ;;  %v5070_v37 = vld [vmem:[%s6588_s1 + $0x3e0] ss:$8 sps:$4 sm:$0xff]  }
 0x3d4   : > { %1496 = vmatpush1.bf16.msra.mxu0 %v5031_v38  ;;  %v5075_v38 = vld [vmem:[%s6588_s1 + $0x3f4] ss:$8 sps:$4 sm:$0xff]  }
 0x3d5   : > { %1497 = vmatprep.subr.bf16.mxu0 %v5036_v40  ;;  %v5073_v40 = vld [vmem:[%s6588_s1 + $0x3f0] ss:$8 sps:$4 sm:$0xff]  }
 0x3d8   : > { %1498 = vmatpush1.bf16.msra.mxu0 %v5034_v41  ;;  %v5078_v41 = vld [vmem:[%s6588_s1 + $0x404] ss:$8 sps:$4 sm:$0xff]  }
 0x3d9   : > { %1499 = vmatprep.subr.bf16.mxu0 %v5039_v43  ;;  %v5076_v43 = vld [vmem:[%s6588_s1 + $0x400] ss:$8 sps:$4 sm:$0xff]  }
 0x3dc   : > { %1500 = vmatpush1.bf16.msra.mxu0 %v5037_v44  ;;  %v5081_v44 = vld [vmem:[%s6588_s1 + $0x414] ss:$8 sps:$4 sm:$0xff]  }
 0x3dd   : > { %1501 = vmatprep.subr.bf16.mxu0 %v5042_v45  ;;  %v5079_v45 = vld [vmem:[%s6588_s1 + $0x410] ss:$8 sps:$4 sm:$0xff]  }
 0x3e0   : > { %1502 = vmatpush1.bf16.msra.mxu0 %v5040_v46  ;;  %v5084_v46 = vld [vmem:[%s6588_s1 + $0x424] ss:$8 sps:$4 sm:$0xff]  }
 0x3e1   : > { %1503 = vmatprep.subr.bf16.mxu0 %v5045_v42  ;;  %v5082_v42 = vld [vmem:[%s6588_s1 + $0x420] ss:$8 sps:$4 sm:$0xff]  }
 0x3e4   : > { %1504 = vmatpush1.bf16.msra.mxu0 %v5043_v47  ;;  %v5087_v47 = vld [vmem:[%s6588_s1 + $0x434] ss:$8 sps:$4 sm:$0xff]  }
 0x3e5   : > { %1505 = vmatprep.subr.bf16.mxu0 %v5048_v48  ;;  %v5085_v48 = vld [vmem:[%s6588_s1 + $0x430] ss:$8 sps:$4 sm:$0xff]  }
 0x3e8   : > { %1506 = vmatpush1.bf16.msra.mxu0 %v5046_v50  ;;  %v5088_v50 = vld [vmem:[%s6588_s1 + $0x440] ss:$8 sps:$4 sm:$0xff]  }
 0x3e9   : > { %1507 = vmatprep.subr.bf16.mxu0 %v5051_v51  ;;  %v5093_v51 = vld [vmem:[%s6588_s1 + $0x454] ss:$8 sps:$4 sm:$0xff]  }
 0x3ec   : > { %1508 = vmatpush1.bf16.msra.mxu0 %v5049_v55  ;;  %v5094_v55 = vld [vmem:[%s6588_s1 + $0x460] ss:$8 sps:$4 sm:$0xff]  }
 0x3ed   : > { %1520 = vmatprep.subr.bf16.mxu0 %v5054_v57  ;;  %v5097_v57 = vld [vmem:[%s6588_s1 + $0x470] ss:$8 sps:$4 sm:$0xff]  }
 0x3ef   : > { %1510 = vmatmul.mubr.bf16.vlgmr.msra.gmra.mrb[0].mxu0 %v1265_v63  ;;  %v1567_v63 = vld [vmem:[#allocation2] sm:$0xf8] }
 0x3f0   : > { %1521 = vmatpush1.bf16.msra.mxu0 %v5052_v60  ;;  %1552 = vmatprep.mubr.bf16.mxu0 %v5300_v26  ;;  %v5100_v60 = vld [vmem:[%s6588_s1 + $0x480] ss:$8 sps:$4 sm:$0xff]   ;;  %v1573_v1 = vpack.c.bf16 %v5686_v17, %v1567_v63 }
 0x3f1   : > { %1522 = vmatprep.subr.bf16.mxu0 %v5057_v62  ;;  %v1576_v62 = vpack.c.bf16 %v1570_v59, %v1570_v59  ;;  %v5130_v59 = vld [vmem:[%s6588_s1 + $0x520] ss:$8 sps:$4 sm:$0xff]  }
 0x3f2   : > { %v1622_v6 = vshrl.u32 %v1573_v1, 16  ;;  %v1625_v7 = vshll.u32 %v1573_v1, 16  ;;  %v5136_v63 = vld [vmem:[%s6588_s1 + $0x540] ss:$8 sps:$4 sm:$0xff]   ;;  %v5139_v1 = vld [vmem:[%s6588_s1 + $0x550] ss:$8 sps:$4 sm:$0xff]  }
 0x3f3   : > { %v1633_v4 = vshll.u32 %v1576_v62, 16 }
 0x3f4   : > { %1523 = vmatpush1.bf16.msra.mxu0 %v5055_v2  ;;  %v5108_v2 = vld [vmem:[%s6588_s1 + $0x4a4] ss:$8 sps:$4 sm:$0xff]   ;;  %v1624_v15 = vrot.slane %v1622_v6, 1  ;;  %v1627_v16 = vrot.slane %v1625_v7, 2  ;;  %v5148_v7 = vld [vmem:[%s6588_s1 + $0x580] ss:$8 sps:$4 sm:$0xff]  }
 0x3f5   : > { %1524 = vmatprep.subr.bf16.mxu0 %v5060_v3  ;;  %v1630_v3 = vshrl.u32 %v1576_v62, 16  ;;  %v1635_v13 = vrot.slane %v1633_v4, 2  ;;  %v5138_v62 = vld [vmem:[%s6588_s1 + $0x544] ss:$8 sps:$4 sm:$0xff]   ;;  %v5147_v4 = vld [vmem:[%s6588_s1 + $0x574] ss:$8 sps:$4 sm:$0xff]  }
 0x3f6   : > { %v1628_v32 = vor.u32 %v1627_v16, %v1624_v15  ;;  %v5150_v6 = vld [vmem:[%s6588_s1 + $0x584] ss:$8 sps:$4 sm:$0xff]   ;;  %v5159_v15 = vld [vmem:[%s6588_s1 + $0x5b4] ss:$8 sps:$4 sm:$0xff]   ;;  %v5157_v16 = vld [vmem:[%s6588_s1 + $0x5b0] ss:$8 sps:$4 sm:$0xff]  }
 0x3f8   : > { %1525 = vmatpush1.bf16.msra.mxu0 %v5058_v9  ;;  %v5111_v9 = vld [vmem:[%s6588_s1 + $0x4b4] ss:$8 sps:$4 sm:$0xff]  }
 0x3f9   : > { %1526 = vmatprep.subr.bf16.mxu0 %v5063_v10  ;;  %v1632_v10 = vrot.slane %v1630_v3, 1  ;;  %v5142_v3 = vld [vmem:[%s6588_s1 + $0x560] ss:$8 sps:$4 sm:$0xff]  }
 0x3fb   : > { %v1636_v18 = vor.u32 %v1635_v13, %v1632_v10  ;;  %v5151_v10 = vld [vmem:[%s6588_s1 + $0x590] ss:$8 sps:$4 sm:$0xff]   ;;  %v5156_v13 = vld [vmem:[%s6588_s1 + $0x5a4] ss:$8 sps:$4 sm:$0xff]  }
 0x3fc   : > { %1527 = vmatpush1.bf16.msra.mxu0 %v5061_v20  ;;  %v1572_v20 = vld [vmem:[#allocation2 + $0x40] sm:$0x7] }
 0x3fd   : > { %1877 = vmatprep.subr.bf16.mxu0 %v5066_v21  ;;  %v5112_v21 = vld [vmem:[%s6588_s1 + $0x4c0] ss:$8 sps:$4 sm:$0xff]   ;;  %v1637_v23 = vsel %vm1620_vm12, %v1628_v32, %v1636_v18  ;;  %v1578_v24 = vpack.c.bf16 %v1572_v20, %v1572_v20  ;;  %v5165_v20 = vld [vmem:[%s6588_s1 + $0x5d4] ss:$8 sps:$4 sm:$0xff]   ;;  %v5163_v32 = vld [vmem:[%s6588_s1 + $0x5d0] ss:$8 sps:$4 sm:$0xff]  }
 0x3fe   : > { %v5160_v18 = vld [vmem:[%s6588_s1 + $0x5c0] ss:$8 sps:$4 sm:$0xff]  }
 0x3ff   : > { %4209 = vmatmul.mubr.msk.bf16.vlgmr.msra.gmra.mrb[0].mxu0 %vm824_vm10, %v1271_v31  ;;  %v1667_v31 = vshll.u32 %v1578_v24, 16 }
 0x400   : > { %1878 = vmatpush1.bf16.msra.mxu0 %v5064_v28  ;;  %1909 = vmatprep.mubr.bf16.mxu0 %v1654_v33  ;;  %v1575_v28 = vpack.c.bf16 %v5716_v52, %v1569_v25  ;;  %v5118_v33 = vld [vmem:[%s6588_s1 + $0x4e0] ss:$8 sps:$4 sm:$0xff]  }
 0x401   : > { %1879 = vmatprep.subr.bf16.mxu0 %v5069_v30  ;;  %v1664_v30 = vshrl.u32 %v1578_v24, 16  ;;  %v5171_v24 = vld [vmem:[%s6588_s1 + $0x5f4] ss:$8 sps:$4 sm:$0xff]  }
 0x404   : > { %1880 = vmatpush1.bf16.msra.mxu0 %v5067_v35  ;;  %v1656_v35 = vshrl.u32 %v1575_v28, 16 }
 0x405   : > { %1881 = vmatprep.subr.bf16.mxu0 %v5072_v36  ;;  %v1659_v36 = vshll.u32 %v1575_v28, 16  ;;  %v5169_v28 = vld [vmem:[%s6588_s1 + $0x5f0] ss:$8 sps:$4 sm:$0xff]  }
 0x408   : > { %1882 = vmatpush1.bf16.msra.mxu0 %v5070_v37  ;;  %v1971_v37 = vld [vmem:[#allocation2 + $0x38] sm:$0xf] }
 0x409   : > { %1883 = vmatprep.subr.bf16.mxu0 %v5075_v38  ;;  %v5123_v38 = vld [vmem:[%s6588_s1 + $0x4f4] ss:$8 sps:$4 sm:$0xff]  }
 0x40c   : > { %1884 = vmatpush1.bf16.msra.mxu0 %v5073_v40  ;;  %v1666_v40 = vrot.slane %v1664_v30, 1  ;;  %v5174_v30 = vld [vmem:[%s6588_s1 + $0x604] ss:$8 sps:$4 sm:$0xff]  }
 0x40d   : > { %1885 = vmatprep.subr.bf16.mxu0 %v5078_v41  ;;  %v1669_v41 = vrot.slane %v1667_v31, 2 }
 0x410   : > { %1886 = vmatpush1.bf16.msra.mxu0 %v5076_v43  ;;  %v1968_v43 = vld [vmem:[#allocation2 + $0x8] sm:$0xf0] }
 0x411   : > { %1887 = vmatprep.subr.bf16.mxu0 %v5081_v44  ;;  %v1977_v44 = vpack.c.bf16 %v1971_v37, %v1971_v37  ;;  %v5177_v37 = vld [vmem:[%s6588_s1 + $0x614] ss:$8 sps:$4 sm:$0xff]  }
 0x414   : > { %1888 = vmatpush1.bf16.msra.mxu0 %v5079_v45  ;;  %v5121_v45 = vld [vmem:[%s6588_s1 + $0x4f0] ss:$8 sps:$4 sm:$0xff]  }
 0x415   : > { %1889 = vmatprep.subr.bf16.mxu0 %v5084_v46  ;;  %v1658_v46 = vrot.slane %v1656_v35, 1  ;;  %v5172_v35 = vld [vmem:[%s6588_s1 + $0x600] ss:$8 sps:$4 sm:$0xff]  }
 0x418   : > { %1890 = vmatpush1.bf16.msra.mxu0 %v5082_v42  ;;  %v1661_v42 = vrot.slane %v1659_v36, 2 }
 0x419   : > { %1891 = vmatprep.subr.bf16.mxu0 %v5087_v47  ;;  %v5126_v47 = vld [vmem:[%s6588_s1 + $0x504] ss:$8 sps:$4 sm:$0xff]  }
 0x41c   : > { %1892 = vmatpush1.bf16.msra.mxu0 %v5085_v48  ;;  %v1974_v48 = vpack.c.bf16 %v5676_v8, %v1968_v43  ;;  %v5175_v43 = vld [vmem:[%s6588_s1 + $0x610] ss:$8 sps:$4 sm:$0xff]  }
 0x41d   : > { %1893 = vmatprep.subr.bf16.mxu0 %v5090_v49  ;;  %v1670_v49 = vor.u32 %v1669_v41, %v1666_v40 }
 0x420   : > { %1894 = vmatpush1.bf16.msra.mxu0 %v5088_v50  ;;  %v2031_v50 = vrot.slane %v1977_v44, 2  ;;  %v5180_v44 = vld [vmem:[%s6588_s1 + $0x624] ss:$8 sps:$4 sm:$0xff]  }
 0x421   : > { %1895 = vmatprep.subr.bf16.mxu0 %v5093_v51  ;;  %v1662_v51 = vor.u32 %v1661_v42, %v1658_v46  ;;  %v5178_v46 = vld [vmem:[%s6588_s1 + $0x620] ss:$8 sps:$4 sm:$0xff]   ;;  %v5183_v42 = vld [vmem:[%s6588_s1 + $0x634] ss:$8 sps:$4 sm:$0xff]  }
 0x424   : > { %1896 = vmatpush1.bf16.msra.mxu0 %v5091_v53  ;;  %v5124_v53 = vld [vmem:[%s6588_s1 + $0x500] ss:$8 sps:$4 sm:$0xff]  }
 0x425   : > { %1897 = vmatprep.subr.bf16.mxu0 %v5096_v54  ;;  %v2030_v54 = vrot.slane %v1974_v48, 2  ;;  %v1969_v48 = vld [vmem:[#allocation2 + $0x10] sm:$0xf0] }
 0x427   : > { %v2032_v8 = vsel %vm2026_vm13, %v2030_v54, %v2031_v50  ;;  %v435_v54 = vld [vmem:[%s6589_s2] sm:$0x3] }
 0x428   : > { %1898 = vmatpush1.bf16.msra.mxu0 %v5094_v55  ;;  %v5129_v55 = vld [vmem:[%s6588_s1 + $0x514] ss:$8 sps:$4 sm:$0xff]  }
 0x429   : > { %1899 = vmatprep.subr.bf16.mxu0 %v5099_v56  ;;  %v1671_v56 = vsel %vm1620_vm12, %v1662_v51, %v1670_v49  ;;  %v1975_v49 = vpack.c.bf16 %v5716_v52, %v1969_v48  ;;  %v2339_v52 = vrot.slane %v435_v54, %v5579_v11 }
 0x42b   : > { %v2033_v51 = vrot.slane %v1975_v49, 2 }
 0x42c   : > { %1900 = vmatpush1.bf16.msra.mxu0 %v5097_v57  ;;  %v5127_v57 = vld [vmem:[%s6588_s1 + $0x510] ss:$8 sps:$4 sm:$0xff]  }
 0x42d   : > { %1901 = vmatprep.subr.bf16.mxu0 %v5102_v58  ;;  %v5132_v58 = vld [vmem:[%s6588_s1 + $0x524] ss:$8 sps:$4 sm:$0xff]  }
 0x430   : > { %1902 = vmatpush1.bf16.msra.mxu0 %v5100_v60  ;;  %v5135_v60 = vld [vmem:[%s6588_s1 + $0x534] ss:$8 sps:$4 sm:$0xff]  }
 0x431   : > { %1903 = vmatprep.subr.bf16.mxu0 %v5105_v61  ;;  %v5133_v61 = vld [vmem:[%s6588_s1 + $0x530] ss:$8 sps:$4 sm:$0xff]  }
 0x434   : > { %1904 = vmatpush1.bf16.msra.mxu0 %v5103_v0  ;;  %v5141_v0 = vld [vmem:[%s6588_s1 + $0x554] ss:$8 sps:$4 sm:$0xff]  }
 0x435   : > { %1905 = vmatprep.subr.bf16.mxu0 %v5108_v2  ;;  %v5144_v2 = vld [vmem:[%s6588_s1 + $0x564] ss:$8 sps:$4 sm:$0xff]  }
 0x438   : > { %1906 = vmatpush1.bf16.msra.mxu0 %v5106_v5  ;;  %v5145_v5 = vld [vmem:[%s6588_s1 + $0x570] ss:$8 sps:$4 sm:$0xff]  }
 0x439   : > { %1907 = vmatprep.subr.bf16.mxu0 %v5111_v9  ;;  %v5153_v9 = vld [vmem:[%s6588_s1 + $0x594] ss:$8 sps:$4 sm:$0xff]  }
 0x43c   : > { %1908 = vmatpush1.bf16.msra.mxu0 %v5109_v14  ;;  %v5154_v14 = vld [vmem:[%s6588_s1 + $0x5a0] ss:$8 sps:$4 sm:$0xff]  }
 0x43d   : > { %1920 = vmatprep.subr.bf16.mxu0 %v5114_v12  ;;  %v5162_v12 = vld [vmem:[%s6588_s1 + $0x5c4] ss:$8 sps:$4 sm:$0xff]  }
 0x43f   : > { %1910 = vmatmul.mubr.bf16.vlgmr.msra.gmra.mrb[0].mxu0 %v1637_v23  ;;  %v5166_v23 = vld [vmem:[%s6588_s1 + $0x5e0] ss:$8 sps:$4 sm:$0xff]  }
 0x440   : > { %1921 = vmatpush1.bf16.msra.mxu0 %v5112_v21  ;;  %1952 = vmatprep.mubr.bf16.mxu0 %v5300_v26  ;;  %v5168_v21 = vld [vmem:[%s6588_s1 + $0x5e4] ss:$8 sps:$4 sm:$0xff]  }
 0x441   : > { %1922 = vmatprep.subr.bf16.mxu0 %v5117_v22  ;;  %v1970_v22 = vld [vmem:[#allocation2 + $0x30] sm:$0xf] }
 0x442   : > { %v1976_v25 = vpack.c.bf16 %v1970_v22, %v1970_v22 }
 0x444   : > { %1923 = vmatpush1.bf16.msra.mxu0 %v5115_v27  ;;  %v1967_v27 = vld [vmem:[#allocation2] sm:$0xf0]  ;;  %v2028_v31 = vrot.slane %v1976_v25, 2 }
 0x445   : > { %1924 = vmatprep.subr.bf16.mxu0 %v5120_v29  ;;  %v1973_v29 = vpack.c.bf16 %v5686_v17, %v1967_v27 }
 0x448   : > { %1925 = vmatpush1.bf16.msra.mxu0 %v5118_v33  ;;  %v2027_v33 = vrot.slane %v1973_v29, 2 }
 0x449   : > { %1926 = vmatprep.subr.bf16.mxu0 %v5123_v38 }
 0x44a   : > { %v2029_v17 = vsel %vm2026_vm13, %v2027_v33, %v2028_v31 }
 0x44c   : > { %1927 = vmatpush1.bf16.msra.mxu0 %v5121_v45  ;;  %v1972_v45 = vld [vmem:[#allocation2 + $0x40] sm:$0xf] }
 0x44d   : > { %2241 = vmatprep.subr.bf16.mxu0 %v5126_v47  ;;  %v1978_v47 = vpack.c.bf16 %v1972_v45, %v1972_v45 }
 0x44f   : > { %4290 = vmatmul.mubr.msk.bf16.vlgmr.msra.gmra.mrb[0].mxu0 %vm824_vm10, %v1671_v56  ;;  %v2034_v50 = vrot.slane %v1978_v47, 2 }
 0x450   : > { %2242 = vmatpush1.bf16.msra.mxu0 %v5124_v53  ;;  %2273 = vmatprep.mubr.bf16.mxu0 %v2032_v8  ;;  %v2335_v8 = vrot.slane %v435_v54, %v5382_v39 }
 0x451   : > { %2243 = vmatprep.subr.bf16.mxu0 %v5129_v55  ;;  %v2035_v53 = vsel %vm2026_vm13, %v2033_v51, %v2034_v50 }
 0x454   : > { %2244 = vmatpush1.bf16.msra.mxu0 %v5127_v57 }
 0x455   : > { %2245 = vmatprep.subr.bf16.mxu0 %v5132_v58 }
 0x458   : > { %2246 = vmatpush1.bf16.msra.mxu0 %v5130_v59 }
 0x459   : > { %2247 = vmatprep.subr.bf16.mxu0 %v5135_v60 }
 0x45c   : > { %2248 = vmatpush1.bf16.msra.mxu0 %v5133_v61 }
 0x45d   : > { %2249 = vmatprep.subr.bf16.mxu0 %v5138_v62 }
 0x460   : > { %2250 = vmatpush1.bf16.msra.mxu0 %v5136_v63 }
 0x461   : > { %2251 = vmatprep.subr.bf16.mxu0 %v5141_v0 }
 0x464   : > { %2252 = vmatpush1.bf16.msra.mxu0 %v5139_v1 }
 0x465   : > { %2253 = vmatprep.subr.bf16.mxu0 %v5144_v2 }
 0x468   : > { %2254 = vmatpush1.bf16.msra.mxu0 %v5142_v3 }
 0x469   : > { %2255 = vmatprep.subr.bf16.mxu0 %v5147_v4 }
 0x46c   : > { %2256 = vmatpush1.bf16.msra.mxu0 %v5145_v5 }
 0x46d   : > { %2257 = vmatprep.subr.bf16.mxu0 %v5150_v6 }
 0x470   : > { %2258 = vmatpush1.bf16.msra.mxu0 %v5148_v7 }
 0x471   : > { %2259 = vmatprep.subr.bf16.mxu0 %v5153_v9 }
 0x474   : > { %2260 = vmatpush1.bf16.msra.mxu0 %v5151_v10 }
 0x475   : > { %2261 = vmatprep.subr.bf16.mxu0 %v5156_v13 }
 0x478   : > { %2262 = vmatpush1.bf16.msra.mxu0 %v5154_v14 }
 0x479   : > { %2263 = vmatprep.subr.bf16.mxu0 %v5159_v15 }
 0x47c   : > { %2264 = vmatpush1.bf16.msra.mxu0 %v5157_v16 }
 0x47d   : > { %2265 = vmatprep.subr.bf16.mxu0 %v5162_v12 }
 0x480   : > { %2266 = vmatpush1.bf16.msra.mxu0 %v5160_v18 }
 0x481   : > { %2267 = vmatprep.subr.bf16.mxu0 %v5165_v20 }
 0x484   : > { %2268 = vmatpush1.bf16.msra.mxu0 %v5163_v32 }
 0x485   : > { %2269 = vmatprep.subr.bf16.mxu0 %v5168_v21 }
 0x488   : > { %2270 = vmatpush1.bf16.msra.mxu0 %v5166_v23 }
 0x489   : > { %2271 = vmatprep.subr.bf16.mxu0 %v5171_v24 }
 0x48c   : > { %2272 = vmatpush1.bf16.msra.mxu0 %v5169_v28  ;;  %v905_v36 = vpop.f32.mrb[0].mxu1 }
 0x48d   : > { %2284 = vmatprep.subr.bf16.mxu0 %v5174_v30  ;;  %v907_v38 = vpop.f32.mrb[1].mxu1 }
 0x48e   : > { %v909_v40 = vpop.f32.mrb[2].mxu1 }
 0x48f   : > { %2274 = vmatmul.mubr.bf16.vlgmr.msra.gmra.mrb[0].mxu0 %v2029_v17  ;;  %v911_v41 = vpop.f32.mrb[3].mxu1 }
 0x490   : > { %2285 = vmatpush1.bf16.msra.mxu0 %v5172_v35  ;;  %2316 = vmatprep.mubr.bf16.mxu0 %v5300_v26  ;;  %v5181_v26 = vld [vmem:[%s6588_s1 + $0x630] ss:$8 sps:$4 sm:$0xff]  }
 0x491   : > { %2286 = vmatprep.subr.bf16.mxu0 %v5177_v37 }
 0x494   : > { %2287 = vmatpush1.bf16.msra.mxu0 %v5175_v43 }
 0x495   : > { %2288 = vmatprep.subr.bf16.mxu0 %v5180_v44 }
 0x498   : > { %2289 = vmatpush1.bf16.msra.mxu0 %v5178_v46 }
 0x499   : > { %2290 = vmatprep.subr.bf16.mxu0 %v5183_v42 }
 0x49c   : > { %2291 = vmatpush1.bf16.msra.mxu0 %v5181_v26 }
 0x49f   : > { %4371 = vmatmul.mubr.msk.bf16.vlgmr.msra.gmra.mrb[0].mxu0 %vm824_vm10, %v2035_v53 }
 0x572   : > { %v2318_v55 = vpop.f32.mrb[0].mxu0 }
 0x573   : > { %v4837_v56 = vadd.f32 %v2318_v55, %v905_v36  ;;  %v2320_v57 = vpop.f32.mrb[1].mxu0 }
 0x574   : > { %v4838_v58 = vadd.f32 %v2320_v57, %v907_v38  ;;  %v2322_v59 = vpop.f32.mrb[2].mxu0 }
 0x575   : > { %v4839_v60 = vadd.f32 %v2322_v59, %v909_v40  ;;  %v2324_v61 = vpop.f32.mrb[3].mxu0  ;;  %v2342_v63 = vadd.f32 %v4837_v56, %v2335_v8 }
 0x576   : > { %v4840_v62 = vadd.f32 %v2324_v61, %v911_v41  ;;  %v2343_v1 = vadd.f32 %v4838_v58, %v2339_v52 }
 0x577   : > { %v2344_v0 = vadd.f32 %v4839_v60, %v2335_v8 }
 0x578   : > { %v2345_v2 = vadd.f32 %v4840_v62, %v2339_v52 }
 0x579   : > { %v2347_v3 = vadd.f32 %v2344_v0, %v2342_v63 }
 0x57a   : > { %v2354_v4 = vadd.f32 %v2345_v2, %v2343_v1 }
 0x57b   : > { %v2348_v5 = vrot.slane %v2347_v3, 4 }
 0x57c   : > { %v2355_v6 = vrot.slane %v2354_v4, 4 }
 0x57d   : > { %v2349_v7 = vadd.f32 %v2348_v5, %v2347_v3 }
 0x57e   : > { %v2356_v9 = vadd.f32 %v2355_v6, %v2354_v4 }
 0x57f   : > { %v2350_v10 = vrot.slane %v2349_v7, 2 }
 0x580   : > { %v2357_v13 = vrot.slane %v2356_v9, 2 }
 0x581   : > { %v2351_v14 = vadd.f32 %v2350_v10, %v2349_v7 }
 0x582   : > { %v2358_v15 = vadd.f32 %v2357_v13, %v2356_v9 }
 0x583   : > { %v2352_v16 = vrot.slane %v2351_v14, 1 }
 0x584   : > { %v2359_v12 = vrot.slane %v2358_v15, 1 }
 0x585   : > { %v2353_v18 = vadd.f32 %v2352_v16, %v2351_v14  ;;  %v5185_v16 = vld [vmem:[%s6591_s4 + $0xa0] sm:$0xff]  }
 0x586   : > { %v2360_v20 = vadd.f32 %v2359_v12, %v2358_v15  ;;  %v5184_v15 = vld [vmem:[%s6591_s4 + $0xe0] sm:$0xff]   ;;  %v5186_v12 = vld [vmem:[%s6591_s4 + $0xe8] sm:$0xff]  }
 0x587   : > { %2361 = vrot.lane.b32.xlu0 %v2353_v18, %s5296_s30  ;;  %4642 = vmatprep.subr.bf16.mxu1 %v5184_v15 }
 0x588   : > { %2363 = vrot.lane.b32.xlu1 %v2360_v20, %s5296_s30  ;;  %4643 = vmatpush3.bf16.msra.mxu1 %v5185_v16 }
 0x589   : > { %4644 = vmatprep.subr.bf16.mxu1 %v5186_v12 }
 0x5f9   : > { %v2362_v32 = vpop.permute.xlu0 %2361 }
 0x5fa   : > { %v2364_v21 = vpop.permute.xlu1 %2363 }
 0x5fb   : > { %v2365_v22 = vsel %vm325_vm0, %v2362_v32, %v2364_v21  ;;  %v2366_v23 = vsel %vm325_vm0, %v2364_v21, %v2362_v32 }
 0x5fc   : > { %v2367_v24 = vadd.f32 %v2366_v23, %v2353_v18  ;;  %v2368_v25 = vadd.f32 %v2365_v22, %v2360_v20  ;;  %v5187_v18 = vld [vmem:[%s6591_s4 + $0xa8] sm:$0xff]  }
 0x5fd   : > { %4645 = vmatpush3.bf16.msra.mxu1 %v5187_v18 }
 0x5fe   : > { %2369 = vrot.lane.b32.xlu0 %v2367_v24, %s5297_s8  ;;  %2371 = vrot.lane.b32.xlu1 %v2368_v25, %s5297_s8 }
 0x670   : > { %v2370_v27 = vpop.permute.xlu0 %2369  ;;  %v2372_v28 = vpop.permute.xlu1 %2371 }
 0x671   : > { %v2373_v29 = vsel %vm334_vm1, %v2370_v27, %v2372_v28  ;;  %v2374_v30 = vsel %vm334_vm1, %v2372_v28, %v2370_v27 }
 0x672   : > { %v2375_v31 = vadd.f32 %v2374_v30, %v2367_v24  ;;  %v2376_v33 = vadd.f32 %v2373_v29, %v2368_v25  ;;  %v2346_v29 = vld [vmem:[%s6593_s6] sm:$0x3]  ;;  %v5188_v30 = vld [vmem:[%s6591_s4 + $0xf0] sm:$0xff]  }
 0x673   : > { %4646 = vmatprep.subr.bf16.mxu1 %v5188_v30 }
 0x674   : > { %2377 = vrot.lane.b32.xlu0 %v2375_v31, %s5298_s9  ;;  %2379 = vrot.lane.b32.xlu1 %v2376_v33, %s5298_s9 }
 0x6e6   : > { %v2378_v35 = vpop.permute.xlu0 %2377  ;;  %v2380_v36 = vpop.permute.xlu1 %2379 }
 0x6e7   : > { %v2381_v37 = vsel %vm343_vm2, %v2378_v35, %v2380_v36  ;;  %v2382_v38 = vsel %vm343_vm2, %v2380_v36, %v2378_v35  ;;  %v2461_v35 = vrot.slane %v2346_v29, %v5579_v11  ;;  %v2457_v36 = vrot.slane %v2346_v29, %v5382_v39 }
 0x6e8   : > { %v2383_v17 = vadd.f32 %v2382_v38, %v2375_v31  ;;  %v2384_v40 = vadd.f32 %v2381_v37, %v2376_v33  ;;  %v5189_v31 = vld [vmem:[%s6591_s4 + $0xb0] sm:$0xff]   ;;  %v5190_v37 = vld [vmem:[%s6591_s4 + $0xf8] sm:$0xff]  }
 0x6e9   : > { %4647 = vmatpush3.bf16.msra.mxu1 %v5189_v31  ;;  %v5191_v38 = vld [vmem:[%s6591_s4 + $0xb8] sm:$0xff]   ;;  %v5200_v31 = vld [vmem:[%s6591_s4 + $0x120] sm:$0xff]  }
 0x6ea   : > { %v2385_v41 = vadd.f32 %v2384_v40, %v2383_v17  ;;  %4648 = vmatprep.subr.bf16.mxu1 %v5190_v37 }
 0x6ec   : > { %v2386_v43 = vmul.f32 0.00390625, %v2385_v41 }
 0x6ed   : > { %4649 = vmatpush3.bf16.msra.mxu1 %v5191_v38  ;;  %v5201_v38 = vld [vmem:[%s6591_s4 + $0x128] sm:$0xff]  }
 0x6ee   : > { %v2390_v44 = vrot.slane %v2386_v43, %v5382_v39 }
 0x6f0   : > { %v6148_v45 = vsub.f32 %v2343_v1, %v2390_v44  ;;  %v6150_v46 = vsub.f32 %v2345_v2, %v2390_v44  ;;  %v6152_v42 = vsub.f32 %v2342_v63, %v2390_v44  ;;  %v6154_v47 = vsub.f32 %v2344_v0, %v2390_v44 }
 0x6f2   : > { %v2396_v48 = vmul.f32 %v6148_v45, %v6148_v45  ;;  %v2398_v26 = vmul.f32 %v6150_v46, %v6150_v46  ;;  %v2395_v49 = vmul.f32 %v6152_v42, %v6152_v42  ;;  %v2397_v50 = vmul.f32 %v6154_v47, %v6154_v47 }
 0x6f4   : > { %v2406_v51 = vadd.f32 %v2398_v26, %v2396_v48  ;;  %v2399_v53 = vadd.f32 %v2397_v50, %v2395_v49  ;;  %v5194_v26 = vld [vmem:[%s6591_s4 + $0x108] sm:$0xff]  }
 0x6f6   : > { %v2407_v54 = vrot.slane %v2406_v51, 4  ;;  %v2400_v55 = vrot.slane %v2399_v53, 4 }
 0x6f8   : > { %v2408_v56 = vadd.f32 %v2407_v54, %v2406_v51  ;;  %v2401_v8 = vadd.f32 %v2400_v55, %v2399_v53 }
 0x6fa   : > { %v2409_v57 = vrot.slane %v2408_v56, 2  ;;  %v2402_v58 = vrot.slane %v2401_v8, 2 }
 0x6fc   : > { %v2410_v52 = vadd.f32 %v2409_v57, %v2408_v56  ;;  %v2403_v59 = vadd.f32 %v2402_v58, %v2401_v8  ;;  %v5195_v56 = vld [vmem:[%s6591_s4 + $0xc8] sm:$0xff]   ;;  %v5196_v8 = vld [vmem:[%s6591_s4 + $0x110] sm:$0xff]  }
 0x6fe   : > { %v2411_v60 = vrot.slane %v2410_v52, 1  ;;  %v2404_v61 = vrot.slane %v2403_v59, 1 }
 0x700   : > { %v2412_v62 = vadd.f32 %v2411_v60, %v2410_v52  ;;  %v2405_v63 = vadd.f32 %v2404_v61, %v2403_v59  ;;  %v5197_v52 = vld [vmem:[%s6591_s4 + $0xd0] sm:$0xff]   ;;  %v5198_v59 = vld [vmem:[%s6591_s4 + $0x118] sm:$0xff]  }
 0x701   : > { %v5199_v60 = vld [vmem:[%s6591_s4 + $0xd8] sm:$0xff]  }
 0x702   : > { %2415 = vrot.lane.b32.xlu1 %v2412_v62, %s5296_s30  ;;  %2413 = vrot.lane.b32.xlu0 %v2405_v63, %s5296_s30 }
 0x774   : > { %v2416_v0 = vpop.permute.xlu1 %2415  ;;  %v2414_v1 = vpop.permute.xlu0 %2413 }
 0x775   : > { %v2417_v2 = vsel %vm325_vm0, %v2414_v1, %v2416_v0  ;;  %v2418_v3 = vsel %vm325_vm0, %v2416_v0, %v2414_v1 }
 0x776   : > { %v2419_v4 = vadd.f32 %v2418_v3, %v2405_v63  ;;  %v2420_v5 = vadd.f32 %v2417_v2, %v2412_v62 }
 0x778   : > { %2421 = vrot.lane.b32.xlu0 %v2419_v4, %s5297_s8  ;;  %2423 = vrot.lane.b32.xlu1 %v2420_v5, %s5297_s8 }
 0x7ea   : > { %v2422_v6 = vpop.permute.xlu0 %2421  ;;  %v2424_v7 = vpop.permute.xlu1 %2423 }
 0x7eb   : > { %v2425_v9 = vsel %vm334_vm1, %v2422_v6, %v2424_v7  ;;  %v2426_v10 = vsel %vm334_vm1, %v2424_v7, %v2422_v6 }
 0x7ec   : > { %v2427_v13 = vadd.f32 %v2426_v10, %v2419_v4  ;;  %v2428_v14 = vadd.f32 %v2425_v9, %v2420_v5 }
 0x7ee   : > { %2429 = vrot.lane.b32.xlu0 %v2427_v13, %s5298_s9  ;;  %2431 = vrot.lane.b32.xlu1 %v2428_v14, %s5298_s9 }
 0x860   : > { %v2430_v20 = vpop.permute.xlu0 %2429  ;;  %v2432_v32 = vpop.permute.xlu1 %2431 }
 0x861   : > { %v2433_v21 = vsel %vm343_vm2, %v2430_v20, %v2432_v32  ;;  %v2434_v22 = vsel %vm343_vm2, %v2432_v32, %v2430_v20 }
 0x862   : > { %v2435_v23 = vadd.f32 %v2434_v22, %v2427_v13  ;;  %v2436_v24 = vadd.f32 %v2433_v21, %v2428_v14 }
 0x864   : > { %v2437_v25 = vadd.f32 %v2436_v24, %v2435_v23 }
 0x866   : > { %v2438_v27 = vmul.f32 0.00390625, %v2437_v25 }
 0x868   : > { %v2439_v28 = vadd.f32 1e-05, %v2438_v27 }
 0x86a   : > { %5286 = vrsqrt.f32 %v2439_v28 }
 0x874   : > { %v5287_v19 = vpop.eup %5286 }
 0x875   : > { %v2444_v33 = vrot.slane %v5287_v19, %v5382_v39 }
 0x877   : > { %v2446_v17 = vmul.f32 %v2444_v33, %v6148_v45  ;;  %v2445_v40 = vmul.f32 %v2444_v33, %v6152_v42  ;;  %v2448_v41 = vmul.f32 %v2444_v33, %v6150_v46  ;;  %v2447_v43 = vmul.f32 %v2444_v33, %v6154_v47  ;;  %v5192_v45 = vld [vmem:[%s6591_s4 + $0x100] sm:$0xff]  }
 0x878   : > { %v5193_v46 = vld [vmem:[%s6591_s4 + $0xc0] sm:$0xff]   ;;  %4650 = vmatprep.subr.bf16.mxu1 %v5192_v45 }
 0x879   : > { %vm2450_vm0 = vcmp.ge.f32.partialorder %v2446_v17, 0.0  ;;  %v2465_v39 = vmul.f32 %v2461_v35, %v2446_v17  ;;  %vm2449_vm1 = vcmp.ge.f32.partialorder %v2445_v40, 0.0  ;;  %v2464_v11 = vmul.f32 %v2457_v36, %v2445_v40  ;;  %4651 = vmatpush3.bf16.msra.mxu1 %v5193_v46 }
 0x87a   : > { %vm2452_vm2 = vcmp.ge.f32.partialorder %v2448_v41, 0.0  ;;  %v2467_v44 = vmul.f32 %v2461_v35, %v2448_v41  ;;  %vm2451_vm15 = vcmp.ge.f32.partialorder %v2447_v43, 0.0  ;;  %v2466_v48 = vmul.f32 %v2457_v36, %v2447_v43  ;;  %4652 = vmatprep.subr.bf16.mxu1 %v5194_v26  ;;  %v5205_v26 = vld [vmem:[%s6591_s4] sm:$0xff]  }
 0x87b   : > { %v2469_v42 = vsel %vm2450_vm0, %v2446_v17, %v2465_v39  ;;  %v2468_v47 = vsel %vm2449_vm1, %v2445_v40, %v2464_v11  ;;  %v5203_v11 = vld [vmem:[%s6591_s4 + $0x138] sm:$0xff]  }
 0x87c   : > { %v2478_v49 = vrot.slane %v2469_v42, 6  ;;  %v2477_v50 = vrot.slane %v2468_v47, 6  ;;  %v2471_v51 = vsel %vm2452_vm2, %v2448_v41, %v2467_v44  ;;  %v2470_v53 = vsel %vm2451_vm15, %v2447_v43, %v2466_v48  ;;  %v5202_v41 = vld [vmem:[%s6591_s4 + $0x130] sm:$0xff]   ;;  %v5204_v48 = vld [vmem:[%s6591_s4 + $0x40] sm:$0xff]  }
 0x87d   : > { %v2481_v54 = vrot.slane %v2471_v51, 6  ;;  %v2479_v55 = vrot.slane %v2470_v53, 6  ;;  %4653 = vmatpush3.bf16.msra.mxu1 %v5195_v56  ;;  %v5207_v53 = vld [vmem:[%s6591_s4 + $0x8] sm:$0xff]   ;;  %v5210_v56 = vld [vmem:[%s6591_s4 + $0x58] sm:$0xff]  }
 0x87e   : > { %2485 = vrot.lane.b32.xlu1 %v2478_v49, %s5297_s8  ;;  %2483 = vrot.lane.b32.xlu0 %v2477_v50, %s5297_s8 }
 0x87f   : > { %v2482_v57 = vsel %vm440_vm14, %v2478_v49, %v2481_v54  ;;  %v2480_v58 = vsel %vm440_vm14, %v2477_v50, %v2479_v55  ;;  %4654 = vmatprep.subr.bf16.mxu1 %v5196_v8  ;;  %v5206_v49 = vld [vmem:[%s6591_s4 + $0x48] sm:$0xff]   ;;  %v5211_v8 = vld [vmem:[%s6591_s4 + $0x18] sm:$0xff]  }
 0x881   : > { %4655 = vmatpush3.bf16.msra.mxu1 %v5197_v52  ;;  %v5214_v52 = vld [vmem:[%s6591_s4 + $0x68] sm:$0xff]  }
 0x882   : > { %2489 = vrot.lane.b32.xlu1 %v2482_v57, %s5297_s8  ;;  %2487 = vrot.lane.b32.xlu0 %v2480_v58, %s5297_s8  ;;  %v5212_v57 = vld [vmem:[%s6591_s4 + $0x60] sm:$0xff]  }
 0x883   : > { %4656 = vmatprep.subr.bf16.mxu1 %v5198_v59  ;;  %v5213_v58 = vld [vmem:[%s6591_s4 + $0x20] sm:$0xff]   ;;  %v5215_v59 = vld [vmem:[%s6591_s4 + $0x28] sm:$0xff]  }
 0x885   : > { %4657 = vmatpush3.bf16.msra.mxu1 %v5199_v60  ;;  %v5216_v60 = vld [vmem:[%s6591_s4 + $0x70] sm:$0xff]  }
 0x886   : > { %2493 = vrot.lane.b32.xlu1 %v2481_v54, %s5297_s8  ;;  %2491 = vrot.lane.b32.xlu0 %v2479_v55, %s5297_s8  ;;  %v5208_v54 = vld [vmem:[%s6591_s4 + $0x50] sm:$0xff]   ;;  %s4641_s8 = sshll.u32 %s6596_s25, 4 }
 0x887   : > { %4777 = vmatprep.subr.bf16.mxu1 %v5299_v34  ;;  %v5209_v55 = vld [vmem:[%s6591_s4 + $0x10] sm:$0xff]   ;;  %s278_s22 = scalar_lea.vmem %s6594_s7, %s4641_s8 }
 0x8f0   : > { %v2486_v61 = vpop.permute.xlu1 %2485  ;;  %v2484_v62 = vpop.permute.xlu0 %2483 }
 0x8f1   : > { %2509 = vst.msk [vmem:[#allocation2 + $0x10] sm:$0xfc] %vm288_vm3, %v2486_v61  ;;  %v2495_v63 = vsel %vm290_vm5, %v2484_v62, %v2486_v61  ;;  %vm5301_vm3 = vmmov 0   ;;  %v5217_v61 = vld [vmem:[%s6591_s4 + $0x30] sm:$0xff]  }
 0x8f2   : > { %2507 = vst.msk [vmem:[#allocation2] sm:$0xfc] %vm471_vm4, %v2484_v62  ;;  %2508 = vst [vmem:[#allocation2 + $0x8] sm:$0xfc] %v2495_v63  ;;  %v5218_v62 = vld [vmem:[%s6591_s4 + $0x78] sm:$0xff]  }
 0x8f3   : > { %v5219_v63 = vld [vmem:[%s6591_s4 + $0x38] sm:$0xff]  }
 0x8f4   : > { %v2490_v0 = vpop.permute.xlu1 %2489  ;;  %v2488_v1 = vpop.permute.xlu0 %2487 }
 0x8f5   : > { %2512 = vst.msk [vmem:[#allocation2 + $0x28] sm:$0xff] %vm290_vm5, %v2490_v0  ;;  %v6254_v2 = vsel %vm290_vm5, %v2488_v1, %v2490_v0 }
 0x8f6   : > { %2510 = vst.msk [vmem:[#allocation2 + $0x18] sm:$0xff] %vm475_vm6, %v2488_v1  ;;  %v5220_v1 = vld [vmem:[%s6591_s4 + $0x80] sm:$0xff]  }
 0x8f8   : > { %v2494_v3 = vpop.permute.xlu1 %2493  ;;  %v2492_v4 = vpop.permute.xlu0 %2491  ;;  %v2567_v36 = vld [vmem:[#allocation2 + $0x10] sm:$0xfe] }
 0x8f9   : > { %2515 = vst.msk [vmem:[#allocation2 + $0x40] sm:$0x3] %vm292_vm8, %v2494_v3  ;;  %v2497_v5 = vsel %vm290_vm5, %v2492_v4, %v2494_v3  ;;  %v2566_v6 = vld [vmem:[#allocation2 + $0x8] sm:$0xfe]  ;;  %v2565_v10 = vld [vmem:[#allocation2] sm:$0xfe] }
 0x8fa   : > { %2513 = vst.msk [vmem:[#allocation2 + $0x30] sm:$0x3] %vm479_vm7, %v2492_v4  ;;  %2514 = vst [vmem:[#allocation2 + $0x38] sm:$0x3] %v2497_v5  ;;  %v2572_v7 = vpack.c.bf16 %v6254_v2, %v2566_v6  ;;  %v2517_v42 = vld [vmem:[#allocation2 + $0x8] sm:$0xff]  ;;  %v2516_v0 = vld [vmem:[#allocation2] sm:$0xff] }
 0x8fb   : > { %v2523_v51 = vpack.c.bf16 %v6254_v2, %v2517_v42  ;;  %v5221_v4 = vld [vmem:[%s6591_s4 + $0x88] sm:$0xff]   ;;  %v5222_v5 = vld [vmem:[%s6591_s4 + $0x90] sm:$0xff]  }
 0x8fc   : > { %v2633_v14 = vshll.u32 %v2572_v7, 16  ;;  %v2631_v23 = vshrl.u32 %v2572_v7, 16  ;;  %v6268_v33 = vld [vmem:[#allocation2 + $0x28] sm:$0xff] }
 0x8fd   : > { %v6261_v9 = vld [vmem:[#allocation2 + $0x18] sm:$0xff]  ;;  %v2573_v17 = vpack.c.bf16 %v6268_v33, %v2567_v36  ;;  %v3067_v7 = vld [vmem:[#allocation2 + $0x8] sm:$0xfc] }
 0x8fe   : > { %v2571_v13 = vpack.c.bf16 %v6261_v9, %v2565_v10  ;;  %v2635_v32 = vrot.slane %v2633_v14, 1  ;;  %v2522_v3 = vpack.c.bf16 %v6261_v9, %v2516_v0  ;;  %v5224_v14 = vld [vmem:[%s6591_s4 + $0x180] sm:$0xff]  }
 0x8ff   : > { %v2645_v43 = vshll.u32 %v2573_v17, 16  ;;  %v2643_v45 = vshrl.u32 %v2573_v17, 16 }
 0x900   : > { %v2621_v15 = vshll.u32 %v2571_v13, 16  ;;  %v2619_v25 = vshrl.u32 %v2571_v13, 16  ;;  %v2636_v28 = vor.u32 %v2635_v32, %v2631_v23  ;;  %v2570_v37 = vld [vmem:[#allocation2 + $0x40] sm:$0x1]  ;;  %v5223_v13 = vld [vmem:[%s6591_s4 + $0x98] sm:$0xff]   ;;  %v5227_v23 = vld [vmem:[%s6591_s4 + $0x148] sm:$0xff]  }
 0x901   : > { %v2568_v16 = vld [vmem:[#allocation2 + $0x30] sm:$0x1]  ;;  %v2569_v12 = vld [vmem:[#allocation2 + $0x38] sm:$0x1]  ;;  %v2576_v40 = vpack.c.bf16 %v2570_v37, %v2570_v37  ;;  %v2647_v44 = vrot.slane %v2645_v43, 1 }
 0x902   : > { %v2574_v18 = vpack.c.bf16 %v2568_v16, %v2568_v16  ;;  %v2575_v20 = vpack.c.bf16 %v2569_v12, %v2569_v12  ;;  %v2623_v21 = vrot.slane %v2621_v15, 1  ;;  %v3070_v6 = vld [vmem:[#allocation2 + $0x38] sm:$0x3]  ;;  %v3073_v15 = vpack.c.bf16 %v6254_v2, %v3067_v7  ;;  %v2518_v12 = vld [vmem:[#allocation2 + $0x10] sm:$0xff] }
 0x903   : > { %v2650_v39 = vshll.u32 %v2576_v40, 16  ;;  %v2648_v47 = vor.u32 %v2647_v44, %v2643_v45  ;;  %v3076_v10 = vpack.c.bf16 %v3070_v6, %v3070_v6  ;;  %v3069_v36 = vld [vmem:[#allocation2 + $0x30] sm:$0x3]  ;;  %v3066_v40 = vld [vmem:[#allocation2] sm:$0xfc] }
 0x904   : > { %v2626_v22 = vshll.u32 %v2574_v18, 16  ;;  %v2638_v24 = vshll.u32 %v2575_v20, 16  ;;  %v2624_v30 = vor.u32 %v2623_v21, %v2619_v25  ;;  %v5225_v18 = vld [vmem:[%s6591_s4 + $0x140] sm:$0xff]   ;;  %v2524_v20 = vpack.c.bf16 %v6268_v33, %v2518_v12  ;;  %v5226_v21 = vld [vmem:[%s6591_s4 + $0x188] sm:$0xff]   ;;  %v5229_v25 = vld [vmem:[%s6591_s4 + $0x150] sm:$0xff]  }
 0x905   : > { %v2652_v46 = vrot.slane %v2650_v39, 1  ;;  %v3129_v16 = vrot.slane %v3076_v10, 1  ;;  %v3128_v32 = vrot.slane %v3073_v15, 1  ;;  %v5237_v37 = vld [vmem:[%s6591_s4 + $0x170] sm:$0xff]   ;;  %v3075_v17 = vpack.c.bf16 %v3069_v36, %v3069_v36  ;;  %v5240_v44 = vld [vmem:[%s6591_s4 + $0x1c0] sm:$0xff]   ;;  %v5247_v10 = vld [vmem:[%s6591_s4 + $0x1e8] sm:$0xff]  }
 0x906   : > { %v2628_v27 = vrot.slane %v2626_v22, 1  ;;  %v2640_v29 = vrot.slane %v2638_v24, 1  ;;  %v5228_v24 = vld [vmem:[%s6591_s4 + $0x190] sm:$0xff]   ;;  %v3072_v43 = vpack.c.bf16 %v6261_v9, %v3066_v40  ;;  %v5250_v15 = vld [vmem:[%s6591_s4 + $0x238] sm:$0xff]   ;;  %v5252_v12 = vld [vmem:[%s6591_s4 + $0x240] sm:$0xff]  }
 0x907   : > { %v2653_v50 = vsel %vm585_vm9, %v2648_v47, %v2652_v46  ;;  %v3130_v22 = vsel %vm1262_vm11, %v3128_v32, %v3129_v16  ;;  %v3126_v39 = vrot.slane %v3075_v17, 1  ;;  %v3344_v46 = vld [vmem:[#allocation2 + $0x8] sm:$0xf8]  ;;  %v5251_v16 = vld [vmem:[%s6591_s4 + $0x1f8] sm:$0xff]  }
 0x908   : > { %v2641_v19 = vsel %vm585_vm9, %v2636_v28, %v2640_v29  ;;  %v2629_v35 = vsel %vm585_vm9, %v2624_v30, %v2628_v27  ;;  %v5230_v27 = vld [vmem:[%s6591_s4 + $0x198] sm:$0xff]   ;;  %v5232_v29 = vld [vmem:[%s6591_s4 + $0x1a0] sm:$0xff]   ;;  %v5241_v47 = vld [vmem:[%s6591_s4 + $0x1c8] sm:$0xff]  }
 0x909   : > { %2811 = vmatprep.mubr.bf16.mxu1 %v2641_v19  ;;  %v5231_v28 = vld [vmem:[%s6591_s4 + $0x158] sm:$0xff]   ;;  %v5233_v30 = vld [vmem:[%s6591_s4 + $0x160] sm:$0xff]   ;;  %v5235_v19 = vld [vmem:[%s6591_s4 + $0x168] sm:$0xff]  }
 0x90a   : > { %2812 = vmatmul.mubr.bf16.vlgmr.msra.gmra.mrb[4].mxu1 %v2629_v35  ;;  %v5236_v35 = vld [vmem:[%s6591_s4 + $0x1b0] sm:$0xff]   ;;  %v5254_v32 = vld [vmem:[%s6591_s4 + $0x248] sm:$0xff]  }
 0x90b   : > { %4778 = vmatpush3.bf16.msra.mxu1 %v5200_v31  ;;  %4785 = vmatprep.mubr.msk.bf16.mxu1 %vm5301_vm3, %v5299_v34  ;;  %v5234_v31 = vld [vmem:[%s6591_s4 + $0x1a8] sm:$0xff]  }
 0x90c   : > { %4779 = vmatprep.subr.bf16.mxu1 %v5299_v34 }
 0x90f   : > { %4780 = vmatpush3.bf16.msra.mxu1 %v5201_v38  ;;  %v5238_v38 = vld [vmem:[%s6591_s4 + $0x1b8] sm:$0xff]  }
 0x910   : > { %4781 = vmatprep.subr.bf16.mxu1 %v5299_v34 }
 0x913   : > { %4782 = vmatpush3.bf16.msra.mxu1 %v5202_v41  ;;  %v5239_v41 = vld [vmem:[%s6591_s4 + $0x178] sm:$0xff]  }
 0x914   : > { %4783 = vmatprep.subr.bf16.mxu1 %v5299_v34 }
 0x917   : > { %4784 = vmatpush3.bf16.msra.mxu1 %v5203_v11  ;;  %v3125_v11 = vrot.slane %v3072_v43, 1 }
 0x918   : > { %4669 = vmatprep.subr.bf16.mxu1 %v5204_v48  ;;  %v3347_v48 = vld [vmem:[#allocation2 + $0x38] sm:$0x7] }
 0x919   : > { %v3127_v45 = vsel %vm1262_vm11, %v3125_v11, %v3126_v39  ;;  %v3353_v42 = vpack.c.bf16 %v3347_v48, %v3347_v48  ;;  %v5260_v39 = vld [vmem:[%s6591_s4 + $0x260] sm:$0xff]   ;;  %v3345_v48 = vld [vmem:[#allocation2 + $0x10] sm:$0xf8] }
 0x91a   : > { %4786 = vmatmul.mubr.msk.bf16.vlgmr.msra.gmra.mrb[8].mxu1 %vm824_vm10, %v2653_v50 }
 0x91b   : > { %4670 = vmatpush3.bf16.msra.mxu1 %v5205_v26  ;;  %3016 = vmatprep.mubr.bf16.mxu1 %v2523_v51  ;;  %v3350_v26 = vpack.c.bf16 %v6254_v2, %v3344_v46  ;;  %v3422_v50 = vshrl.u32 %v3353_v42, 16  ;;  %v3425_v51 = vshll.u32 %v3353_v42, 16  ;;  %v3351_v46 = vpack.c.bf16 %v6268_v33, %v3345_v48 }
 0x91c   : > { %4671 = vmatprep.subr.bf16.mxu1 %v5206_v49  ;;  %v3071_v49 = vld [vmem:[#allocation2 + $0x40] sm:$0x3] }
 0x91f   : > { %4672 = vmatpush3.bf16.msra.mxu1 %v5207_v53  ;;  %v5242_v53 = vld [vmem:[%s6591_s4 + $0x1d0] sm:$0xff]  }
 0x920   : > { %4673 = vmatprep.subr.bf16.mxu1 %v5208_v54  ;;  %v3414_v54 = vshrl.u32 %v3350_v26, 16 }
 0x923   : > { %4674 = vmatpush3.bf16.msra.mxu1 %v5209_v55  ;;  %v3417_v55 = vshll.u32 %v3350_v26, 16  ;;  %v5262_v26 = vld [vmem:[%s6591_s4 + $0x270] sm:$0xff]  }
 0x924   : > { %4675 = vmatprep.subr.bf16.mxu1 %v5210_v56  ;;  %v3077_v56 = vpack.c.bf16 %v3071_v49, %v3071_v49  ;;  %v3431_v49 = vshrl.u32 %v3351_v46, 16 }
 0x927   : > { %4676 = vmatpush3.bf16.msra.mxu1 %v5211_v8  ;;  %v3068_v8 = vld [vmem:[#allocation2 + $0x10] sm:$0xfc] }
 0x928   : > { %4677 = vmatprep.subr.bf16.mxu1 %v5212_v57  ;;  %v3424_v57 = vrot.slane %v3422_v50, 1  ;;  %v3434_v50 = vshll.u32 %v3351_v46, 16 }
 0x92b   : > { %4678 = vmatpush3.bf16.msra.mxu1 %v5213_v58  ;;  %v3427_v58 = vrot.slane %v3425_v51, 2  ;;  %v3660_v51 = vld [vmem:[#allocation2 + $0x38] sm:$0xf] }
 0x92c   : > { %4679 = vmatprep.subr.bf16.mxu1 %v5214_v52  ;;  %v5243_v52 = vld [vmem:[%s6591_s4 + $0x1d8] sm:$0xff]  }
 0x92d   : > { %v3428_v0 = vor.u32 %v3427_v58, %v3424_v57  ;;  %v3433_v57 = vrot.slane %v3431_v49, 1  ;;  %v3436_v58 = vrot.slane %v3434_v50, 2 }
 0x92f   : > { %4680 = vmatpush3.bf16.msra.mxu1 %v5215_v59  ;;  %v3074_v59 = vpack.c.bf16 %v6268_v33, %v3068_v8  ;;  %v5263_v8 = vld [vmem:[%s6591_s4 + $0x278] sm:$0xff]  }
 0x930   : > { %4681 = vmatprep.subr.bf16.mxu1 %v5216_v60  ;;  %v5244_v60 = vld [vmem:[%s6591_s4 + $0x220] sm:$0xff]  }
 0x933   : > { %4682 = vmatpush3.bf16.msra.mxu1 %v5217_v61  ;;  %v3416_v61 = vrot.slane %v3414_v54, 1 }
 0x934   : > { %4683 = vmatprep.subr.bf16.mxu1 %v5218_v62  ;;  %v3419_v62 = vrot.slane %v3417_v55, 2  ;;  %v3657_v55 = vld [vmem:[#allocation2 + $0x8] sm:$0xf0] }
 0x937   : > { %4684 = vmatpush3.bf16.msra.mxu1 %v5219_v63  ;;  %v3132_v63 = vrot.slane %v3077_v56, 1  ;;  %v3666_v56 = vpack.c.bf16 %v3660_v51, %v3660_v51 }
 0x938   : > { %4789 = vmatprep.subr.bf16.mxu1 %v5299_v34 }
 0x93a   : > { %3017 = vmatmul.mubr.bf16.vlgmr.msra.gmra.mrb[12].mxu1 %v2522_v3  ;;  %v5245_v3 = vld [vmem:[%s6591_s4 + $0x1e0] sm:$0xff]  }
 0x93b   : > { %4790 = vmatpush3.bf16.msra.mxu1 %v5220_v1  ;;  %4797 = vmatprep.mubr.msk.bf16.mxu1 %vm5301_vm3, %v5299_v34  ;;  %v3131_v1 = vrot.slane %v3074_v59, 1  ;;  %v3663_v59 = vpack.c.bf16 %v6254_v2, %v3657_v55 }
 0x93c   : > { %4791 = vmatprep.subr.bf16.mxu1 %v5299_v34 }
 0x93d   : > { %v3133_v6 = vsel %vm1262_vm11, %v3131_v1, %v3132_v63  ;;  %v5265_v63 = vld [vmem:[%s6591_s4 + $0x280] sm:$0xff]   ;;  %v5266_v1 = vld [vmem:[%s6591_s4 + $0x2c8] sm:$0xff]  }
 0x93f   : > { %4792 = vmatpush3.bf16.msra.mxu1 %v5221_v4  ;;  %v3420_v4 = vor.u32 %v3419_v62, %v3416_v61  ;;  %v3719_v61 = vrot.slane %v3666_v56, 2  ;;  %v3437_v62 = vor.u32 %v3436_v58, %v3433_v57 }
 0x940   : > { %4793 = vmatprep.subr.bf16.mxu1 %v5299_v34 }
 0x941   : > { %v3429_v7 = vsel %vm1620_vm12, %v3420_v4, %v3428_v0  ;;  %v3718_v0 = vrot.slane %v3663_v59, 2  ;;  %v5267_v4 = vld [vmem:[%s6591_s4 + $0x288] sm:$0xff]  }
 0x943   : > { %4794 = vmatpush3.bf16.msra.mxu1 %v5222_v5  ;;  %v5246_v5 = vld [vmem:[%s6591_s4 + $0x228] sm:$0xff]   ;;  %v3720_v2 = vsel %vm2026_vm13, %v3718_v0, %v3719_v61 }
 0x944   : > { %4795 = vmatprep.subr.bf16.mxu1 %v5299_v34 }
 0x947   : > { %4796 = vmatpush3.bf16.msra.mxu1 %v5223_v13  ;;  %v5248_v13 = vld [vmem:[%s6591_s4 + $0x230] sm:$0xff]  }
 0x948   : > { %4696 = vmatprep.subr.bf16.mxu1 %v5224_v14  ;;  %v5249_v14 = vld [vmem:[%s6591_s4 + $0x1f0] sm:$0xff]  }
 0x94a   : > { %4798 = vmatmul.mubr.msk.bf16.vlgmr.msra.gmra.mrb[16].mxu1 %vm824_vm10, %v2524_v20  ;;  %v5253_v20 = vld [vmem:[%s6591_s4 + $0x200] sm:$0xff]  }
 0x94b   : > { %4697 = vmatpush3.bf16.msra.mxu1 %v5225_v18  ;;  %3291 = vmatprep.mubr.bf16.mxu1 %v3130_v22  ;;  %v3346_v18 = vld [vmem:[#allocation2 + $0x30] sm:$0x7]  ;;  %v3343_v22 = vld [vmem:[#allocation2] sm:$0xf8] }
 0x94c   : > { %4698 = vmatprep.subr.bf16.mxu1 %v5226_v21  ;;  %v3352_v21 = vpack.c.bf16 %v3346_v18, %v3346_v18  ;;  %v3659_v18 = vld [vmem:[#allocation2 + $0x30] sm:$0xf] }
 0x94f   : > { %4699 = vmatpush3.bf16.msra.mxu1 %v5227_v23  ;;  %v5255_v23 = vld [vmem:[%s6591_s4 + $0x208] sm:$0xff]  }
 0x950   : > { %4700 = vmatprep.subr.bf16.mxu1 %v5228_v24  ;;  %v3349_v24 = vpack.c.bf16 %v6261_v9, %v3343_v22  ;;  %v3656_v22 = vld [vmem:[#allocation2] sm:$0xf0] }
 0x953   : > { %4701 = vmatpush3.bf16.msra.mxu1 %v5229_v25  ;;  %v5256_v25 = vld [vmem:[%s6591_s4 + $0x250] sm:$0xff]  }
 0x954   : > { %4702 = vmatprep.subr.bf16.mxu1 %v5230_v27  ;;  %v3405_v27 = vshrl.u32 %v3352_v21, 16 }
 0x957   : > { %4703 = vmatpush3.bf16.msra.mxu1 %v5231_v28  ;;  %v3408_v28 = vshll.u32 %v3352_v21, 16  ;;  %v3665_v21 = vpack.c.bf16 %v3659_v18, %v3659_v18 }
 0x958   : > { %4704 = vmatprep.subr.bf16.mxu1 %v5232_v29  ;;  %v5257_v29 = vld [vmem:[%s6591_s4 + $0x210] sm:$0xff]  }
 0x959   : > { %v3410_v36 = vrot.slane %v3408_v28, 2  ;;  %v5280_v28 = vld [vmem:[%s6591_s4 + $0x300] sm:$0xff]  }
 0x95b   : > { %4705 = vmatpush3.bf16.msra.mxu1 %v5233_v30  ;;  %v3397_v30 = vshrl.u32 %v3349_v24, 16 }
 0x95c   : > { %4706 = vmatprep.subr.bf16.mxu1 %v5234_v31  ;;  %v3400_v31 = vshll.u32 %v3349_v24, 16  ;;  %v3662_v24 = vpack.c.bf16 %v6261_v9, %v3656_v22  ;;  %v3661_v9 = vld [vmem:[#allocation2 + $0x40] sm:$0xf] }
 0x95e   : > { %v3402_v17 = vrot.slane %v3400_v31, 2  ;;  %v5282_v31 = vld [vmem:[%s6591_s4 + $0x310] sm:$0xff]  }
 0x95f   : > { %4707 = vmatpush3.bf16.msra.mxu1 %v5235_v19  ;;  %v5258_v19 = vld [vmem:[%s6591_s4 + $0x258] sm:$0xff]  }
 0x960   : > { %4708 = vmatprep.subr.bf16.mxu1 %v5236_v35  ;;  %v3407_v35 = vrot.slane %v3405_v27, 1  ;;  %v3715_v27 = vrot.slane %v3662_v24, 2 }
 0x962   : > { %v3411_v40 = vor.u32 %v3410_v36, %v3407_v35  ;;  %v3658_v35 = vld [vmem:[#allocation2 + $0x10] sm:$0xf0]  ;;  %v5283_v36 = vld [vmem:[%s6591_s4 + $0x318] sm:$0xff]  }
 0x963   : > { %4709 = vmatpush3.bf16.msra.mxu1 %v5237_v37  ;;  %v5259_v37 = vld [vmem:[%s6591_s4 + $0x218] sm:$0xff]  }
 0x964   : > { %4710 = vmatprep.subr.bf16.mxu1 %v5238_v38  ;;  %v3399_v38 = vrot.slane %v3397_v30, 1  ;;  %v5281_v30 = vld [vmem:[%s6591_s4 + $0x308] sm:$0xff]  }
 0x966   : > { %v3403_v43 = vor.u32 %v3402_v17, %v3399_v38 }
 0x967   : > { %4711 = vmatpush3.bf16.msra.mxu1 %v5239_v41  ;;  %v3348_v41 = vld [vmem:[#allocation2 + $0x40] sm:$0x7] }
 0x968   : > { %4801 = vmatprep.subr.bf16.mxu1 %v5299_v34  ;;  %v3412_v11 = vsel %vm1620_vm12, %v3403_v43, %v3411_v40 }
 0x96a   : > { %3292 = vmatmul.mubr.bf16.vlgmr.msra.gmra.mrb[20].mxu1 %v3127_v45  ;;  %v5261_v45 = vld [vmem:[%s6591_s4 + $0x268] sm:$0xff]  }
 0x96b   : > { %4802 = vmatpush3.bf16.msra.mxu1 %v5240_v44  ;;  %4809 = vmatprep.mubr.msk.bf16.mxu1 %vm5301_vm3, %v5299_v34  ;;  %v3354_v44 = vpack.c.bf16 %v3348_v41, %v3348_v41 }
 0x96c   : > { %4803 = vmatprep.subr.bf16.mxu1 %v5299_v34 }
 0x96d   : > { %v3439_v42 = vshrl.u32 %v3354_v44, 16 }
 0x96f   : > { %4804 = vmatpush3.bf16.msra.mxu1 %v5241_v47  ;;  %v3442_v47 = vshll.u32 %v3354_v44, 16 }
 0x970   : > { %4805 = vmatprep.subr.bf16.mxu1 %v5299_v34 }
 0x971   : > { %v3444_v54 = vrot.slane %v3442_v47, 2 }
 0x973   : > { %4806 = vmatpush3.bf16.msra.mxu1 %v5242_v53  ;;  %v3441_v53 = vrot.slane %v3439_v42, 1 }
 0x974   : > { %4807 = vmatprep.subr.bf16.mxu1 %v5299_v34 }
 0x977   : > { %4808 = vmatpush3.bf16.msra.mxu1 %v5243_v52  ;;  %v5264_v52 = vld [vmem:[%s6591_s4 + $0x2c0] sm:$0xff]  }
 0x978   : > { %4723 = vmatprep.subr.bf16.mxu1 %v5244_v60  ;;  %v3445_v60 = vor.u32 %v3444_v54, %v3441_v53 }
 0x97a   : > { %4810 = vmatmul.mubr.msk.bf16.vlgmr.msra.gmra.mrb[24].mxu1 %vm824_vm10, %v3133_v6  ;;  %v5269_v6 = vld [vmem:[%s6591_s4 + $0x290] sm:$0xff]  }
 0x97b   : > { %4724 = vmatpush3.bf16.msra.mxu1 %v5245_v3  ;;  %3604 = vmatprep.mubr.bf16.mxu1 %v3429_v7  ;;  %v3446_v3 = vsel %vm1620_vm12, %v3437_v62, %v3445_v60  ;;  %v5270_v7 = vld [vmem:[%s6591_s4 + $0x2d8] sm:$0xff]  }
 0x97c   : > { %4725 = vmatprep.subr.bf16.mxu1 %v5246_v5  ;;  %v5268_v5 = vld [vmem:[%s6591_s4 + $0x2d0] sm:$0xff]  }
 0x97f   : > { %4726 = vmatpush3.bf16.msra.mxu1 %v5247_v10  ;;  %v5271_v10 = vld [vmem:[%s6591_s4 + $0x298] sm:$0xff]  }
 0x980   : > { %4727 = vmatprep.subr.bf16.mxu1 %v5248_v13  ;;  %v5272_v13 = vld [vmem:[%s6591_s4 + $0x2e0] sm:$0xff]  }
 0x983   : > { %4728 = vmatpush3.bf16.msra.mxu1 %v5249_v14  ;;  %v5273_v14 = vld [vmem:[%s6591_s4 + $0x2a0] sm:$0xff]  }
 0x984   : > { %4729 = vmatprep.subr.bf16.mxu1 %v5250_v15  ;;  %v5274_v15 = vld [vmem:[%s6591_s4 + $0x2e8] sm:$0xff]  }
 0x987   : > { %4730 = vmatpush3.bf16.msra.mxu1 %v5251_v16  ;;  %v5275_v16 = vld [vmem:[%s6591_s4 + $0x2a8] sm:$0xff]  }
 0x988   : > { %4731 = vmatprep.subr.bf16.mxu1 %v5252_v12  ;;  %v5276_v12 = vld [vmem:[%s6591_s4 + $0x2f0] sm:$0xff]  }
 0x98b   : > { %4732 = vmatpush3.bf16.msra.mxu1 %v5253_v20  ;;  %v5277_v20 = vld [vmem:[%s6591_s4 + $0x2b0] sm:$0xff]  }
 0x98c   : > { %4733 = vmatprep.subr.bf16.mxu1 %v5254_v32  ;;  %v5278_v32 = vld [vmem:[%s6591_s4 + $0x2f8] sm:$0xff]  }
 0x98f   : > { %4734 = vmatpush3.bf16.msra.mxu1 %v5255_v23  ;;  %v5279_v23 = vld [vmem:[%s6591_s4 + $0x2b8] sm:$0xff]  }
 0x990   : > { %4735 = vmatprep.subr.bf16.mxu1 %v5256_v25  ;;  %v3716_v25 = vrot.slane %v3665_v21, 2 }
 0x993   : > { %4736 = vmatpush3.bf16.msra.mxu1 %v5257_v29  ;;  %v3717_v29 = vsel %vm2026_vm13, %v3715_v27, %v3716_v25 }
 0x994   : > { %4737 = vmatprep.subr.bf16.mxu1 %v5258_v19  ;;  %v3667_v19 = vpack.c.bf16 %v3661_v9, %v3661_v9 }
 0x996   : > { %v3722_v38 = vrot.slane %v3667_v19, 2 }
 0x997   : > { %4738 = vmatpush3.bf16.msra.mxu1 %v5259_v37  ;;  %v3664_v37 = vpack.c.bf16 %v6268_v33, %v3658_v35 }
 0x998   : > { %4813 = vmatprep.subr.bf16.mxu1 %v5299_v34 }
 0x999   : > { %v3721_v17 = vrot.slane %v3664_v37, 2 }
 0x99a   : > { %3605 = vmatmul.mubr.bf16.vlgmr.msra.gmra.mrb[28].mxu1 %v3412_v11 }
 0x99b   : > { %4814 = vmatpush3.bf16.msra.mxu1 %v5260_v39  ;;  %4821 = vmatprep.mubr.msk.bf16.mxu1 %vm5301_vm3, %v5299_v34  ;;  %v3723_v40 = vsel %vm2026_vm13, %v3721_v17, %v3722_v38 }
 0x99c   : > { %4815 = vmatprep.subr.bf16.mxu1 %v5299_v34 }
 0x99f   : > { %4816 = vmatpush3.bf16.msra.mxu1 %v5261_v45 }
 0x9a0   : > { %4817 = vmatprep.subr.bf16.mxu1 %v5299_v34 }
 0x9a3   : > { %4818 = vmatpush3.bf16.msra.mxu1 %v5262_v26 }
 0x9a4   : > { %4819 = vmatprep.subr.bf16.mxu1 %v5299_v34 }
 0x9a7   : > { %4820 = vmatpush3.bf16.msra.mxu1 %v5263_v8 }
 0x9a8   : > { %4750 = vmatprep.subr.bf16.mxu1 %v5264_v52 }
 0x9aa   : > { %4822 = vmatmul.mubr.msk.bf16.vlgmr.msra.gmra.mrb[32].mxu1 %vm824_vm10, %v3446_v3 }
 0x9ab   : > { %4751 = vmatpush3.bf16.msra.mxu1 %v5265_v63  ;;  %3881 = vmatprep.mubr.bf16.mxu1 %v3720_v2 }
 0x9ac   : > { %4752 = vmatprep.subr.bf16.mxu1 %v5266_v1 }
 0x9af   : > { %4753 = vmatpush3.bf16.msra.mxu1 %v5267_v4 }
 0x9b0   : > { %4754 = vmatprep.subr.bf16.mxu1 %v5268_v5 }
 0x9b3   : > { %4755 = vmatpush3.bf16.msra.mxu1 %v5269_v6 }
 0x9b4   : > { %4756 = vmatprep.subr.bf16.mxu1 %v5270_v7 }
 0x9b7   : > { %4757 = vmatpush3.bf16.msra.mxu1 %v5271_v10 }
 0x9b8   : > { %4758 = vmatprep.subr.bf16.mxu1 %v5272_v13 }
 0x9bb   : > { %4759 = vmatpush3.bf16.msra.mxu1 %v5273_v14 }
 0x9bc   : > { %4760 = vmatprep.subr.bf16.mxu1 %v5274_v15 }
 0x9bf   : > { %4761 = vmatpush3.bf16.msra.mxu1 %v5275_v16 }
 0x9c0   : > { %4762 = vmatprep.subr.bf16.mxu1 %v5276_v12 }
 0x9c3   : > { %4763 = vmatpush3.bf16.msra.mxu1 %v5277_v20 }
 0x9c4   : > { %4764 = vmatprep.subr.bf16.mxu1 %v5278_v32 }
 0x9c7   : > { %4765 = vmatpush3.bf16.msra.mxu1 %v5279_v23 }
 0x9c8   : > { %4825 = vmatprep.subr.bf16.mxu1 %v5299_v34 }
 0x9ca   : > { %3882 = vmatmul.mubr.bf16.vlgmr.msra.gmra.mrb[36].mxu1 %v3717_v29 }
 0x9cb   : > { %4826 = vmatpush3.bf16.msra.mxu1 %v5280_v28  ;;  %4833 = vmatprep.mubr.msk.bf16.mxu1 %vm5301_vm3, %v5299_v34 }
 0x9cc   : > { %4827 = vmatprep.subr.bf16.mxu1 %v5299_v34 }
 0x9cf   : > { %4828 = vmatpush3.bf16.msra.mxu1 %v5281_v30 }
 0x9d0   : > { %4829 = vmatprep.subr.bf16.mxu1 %v5299_v34 }
 0x9d3   : > { %4830 = vmatpush3.bf16.msra.mxu1 %v5282_v31 }
 0x9d4   : > { %4831 = vmatprep.subr.bf16.mxu1 %v5299_v34 }
 0x9d7   : > { %4832 = vmatpush3.bf16.msra.mxu1 %v5283_v36 }
 0x9da   : > { %4834 = vmatmul.mubr.msk.bf16.vlgmr.msra.gmra.mrb[40].mxu1 %vm824_vm10, %v3723_v40  ;;  %v4637_v40 = vld [vmem:[%s6592_s5] ss:$0 sm:$0xff] }
 0x9dd   : > { %v4658_v41 = vpop.f32.mrb[4].mxu1 }
 0x9de   : > { %v4659_v43 = vpop.f32.mrb[5].mxu1 }
 0x9df   : > { %v4660_v39 = vadd.f32 %v4659_v43, %v4658_v41  ;;  %v4661_v11 = vpop.f32.mrb[6].mxu1 }
 0x9e0   : > { %v4662_v44 = vpop.f32.mrb[7].mxu1 }
 0x9e1   : > { %v4663_v48 = vadd.f32 %v4662_v44, %v4661_v11 }
 0x9ed   : > { %v2854_v45 = vpop.f32.mrb[8].mxu1 }
 0x9ee   : > { %v2855_v46 = vadd.f32 %v4660_v39, %v2854_v45  ;;  %v4787_v42 = vpop.f32.mrb[9].mxu1 }
 0x9ef   : > { %v2857_v47 = vpop.f32.mrb[10].mxu1 }
 0x9f0   : > { %v2858_v33 = vadd.f32 %v4663_v48, %v2857_v47  ;;  %v4788_v26 = vpop.f32.mrb[11].mxu1 }
 0xa0d   : > { %v4685_v34 = vpop.f32.mrb[12].mxu1 }
 0xa0e   : > { %v4686_v49 = vpop.f32.mrb[13].mxu1 }
 0xa0f   : > { %v4687_v50 = vadd.f32 %v4686_v49, %v4685_v34  ;;  %v4688_v51 = vpop.f32.mrb[14].mxu1 }
 0xa10   : > { %v4689_v53 = vpop.f32.mrb[15].mxu1 }
 0xa11   : > { %v4690_v54 = vadd.f32 %v4689_v53, %v4688_v51  ;;  %v3019_v55 = vadd.f32 %v4687_v50, %v2855_v46 }
 0xa13   : > { %v3022_v56 = vadd.f32 %v4690_v54, %v2858_v33 }
 0xa1d   : > { %v3059_v8 = vpop.f32.mrb[16].mxu1 }
 0xa1e   : > { %v3060_v57 = vadd.f32 %v3059_v8, %v3019_v55  ;;  %v4799_v58 = vpop.f32.mrb[17].mxu1 }
 0xa1f   : > { %v3062_v52 = vpop.f32.mrb[18].mxu1 }
 0xa20   : > { %v3063_v59 = vadd.f32 %v3062_v52, %v3022_v56  ;;  %v4800_v60 = vpop.f32.mrb[19].mxu1 }
 0xa3d   : > { %v4712_v61 = vpop.f32.mrb[20].mxu1 }
 0xa3e   : > { %v4713_v62 = vpop.f32.mrb[21].mxu1 }
 0xa3f   : > { %v4714_v63 = vadd.f32 %v4713_v62, %v4712_v61  ;;  %v4715_v0 = vpop.f32.mrb[22].mxu1 }
 0xa40   : > { %v4716_v1 = vpop.f32.mrb[23].mxu1 }
 0xa41   : > { %v4717_v3 = vadd.f32 %v4716_v1, %v4715_v0 }
 0xa4d   : > { %v3334_v2 = vpop.f32.mrb[24].mxu1 }
 0xa4e   : > { %v3335_v4 = vadd.f32 %v4714_v63, %v3334_v2  ;;  %v4811_v5 = vpop.f32.mrb[25].mxu1 }
 0xa4f   : > { %v3337_v6 = vpop.f32.mrb[26].mxu1 }
 0xa50   : > { %v3341_v7 = vadd.f32 %v3335_v4, %v3060_v57  ;;  %v3338_v10 = vadd.f32 %v4717_v3, %v3337_v6  ;;  %v4812_v13 = vpop.f32.mrb[27].mxu1 }
 0xa52   : > { %v3342_v14 = vadd.f32 %v3338_v10, %v3063_v59 }
 0xa6d   : > { %v4739_v15 = vpop.f32.mrb[28].mxu1 }
 0xa6e   : > { %v4740_v16 = vpop.f32.mrb[29].mxu1 }
 0xa6f   : > { %v4741_v12 = vadd.f32 %v4740_v16, %v4739_v15  ;;  %v4742_v18 = vpop.f32.mrb[30].mxu1 }
 0xa70   : > { %v4743_v20 = vpop.f32.mrb[31].mxu1 }
 0xa71   : > { %v4744_v32 = vadd.f32 %v4743_v20, %v4742_v18 }
 0xa7d   : > { %v3647_v21 = vpop.f32.mrb[32].mxu1 }
 0xa7e   : > { %v3648_v22 = vadd.f32 %v4741_v12, %v3647_v21  ;;  %v4823_v23 = vpop.f32.mrb[33].mxu1 }
 0xa7f   : > { %v3650_v24 = vpop.f32.mrb[34].mxu1 }
 0xa80   : > { %v3654_v25 = vadd.f32 %v3648_v22, %v3341_v7  ;;  %v3651_v27 = vadd.f32 %v4744_v32, %v3650_v24  ;;  %v4824_v28 = vpop.f32.mrb[35].mxu1 }
 0xa82   : > { %v3655_v29 = vadd.f32 %v3651_v27, %v3342_v14 }
 0xa9d   : > { %v4766_v30 = vpop.f32.mrb[36].mxu1 }
 0xa9e   : > { %v4767_v9 = vpop.f32.mrb[37].mxu1 }
 0xa9f   : > { %v4768_v31 = vadd.f32 %v4767_v9, %v4766_v30  ;;  %v4769_v19 = vpop.f32.mrb[38].mxu1 }
 0xaa0   : > { %v4770_v35 = vpop.f32.mrb[39].mxu1 }
 0xaa1   : > { %v4771_v36 = vadd.f32 %v4770_v35, %v4769_v19 }
 0xaad   : > { %v3924_v37 = vpop.f32.mrb[40].mxu1 }
 0xaae   : > { %v3925_v38 = vadd.f32 %v4768_v31, %v3924_v37  ;;  %v4835_v17 = vpop.f32.mrb[41].mxu1 }
 0xaaf   : > { %v3927_v41 = vpop.f32.mrb[42].mxu1 }
 0xab0   : > { %v3931_v43 = vadd.f32 %v3925_v38, %v3654_v25  ;;  %v3928_v39 = vadd.f32 %v4771_v36, %v3927_v41  ;;  %v4836_v11 = vpop.f32.mrb[43].mxu1 }
 0xab2   : > { %v3939_v44 = vadd.f32 %v4637_v40, %v3931_v43  ;;  %v3932_v48 = vadd.f32 %v3928_v39, %v3655_v29 }
 0xab4   : > { %3941 = vst [vmem:[%s278_s22] sm:$0xff] %v3939_v44  ;;  %v3940_v45 = vadd.f32 %v4637_v40, %v3932_v48 }
 0xab6   : > { %3942 = vst [vmem:[%s278_s22 + $0x8] sm:$0xff] %v3940_v45 }
 0xab7 PF: > { %s17_s24 = sadd.s32 1, %s5294_s24  }
 0xab8   : > { %p14_p4 = scmp.ge.s32.totalorder %s17_s24, 4  }
 0xaba   :  { %16 = sbr.rel (!%p14_p4) target bundleno = 1 (0x1), region = 86 }

</bundles_post_ra>
